<compile_context>
chip_gen: v5e
topology: v5e:2x2
jax: 0.10.0
libtpu: 0.0.40
codegen_flags: <defaults>
</compile_context>

<pallas_src>
import math

import jax
import jax.numpy as jnp
from jax.experimental import pallas as pl
from jax.experimental.pallas import tpu as pltpu

_LANE = 128
_SUBLANE = 8


def _lstm_attention_kernel(x_ref, wih0_ref, b0_ref, whh0_ref,
                           wih1_ref, whh1_ref, b1_ref,
                           attn_w_ref, attn_b_ref,
                           lin_w_ref, lin_b_ref,
                           out_ref):
    B = out_ref.shape[0]
    H = whh0_ref.shape[0]
    G = 4 * H
    T = x_ref.shape[0] // B

    # ---- hoisted weight loads: stay live in vregs across the whole time loop ----
    whh0 = whh0_ref[...]                                    # (H, 4H)
    wih1 = wih1_ref[...]                                    # (H, 4H)
    whh1 = whh1_ref[...]                                    # (H, 4H)
    b1 = jnp.broadcast_to(b1_ref[...], (B, G))              # hoisted broadcast

    # ---- layer-1 input projection for all timesteps in one MXU matmul ----
    # Kept as a live value (T*B x 4H f32 = 8 vregs here); no VMEM scratch round-trip.
    xp = (jnp.dot(x_ref[...], wih0_ref[...], preferred_element_type=jnp.float32)
          + b0_ref[...])                                    # (T*B, 4H)

    def activate(gates, c):
        # One sigmoid + one tanh full-vreg EUP push, then per-gate lane slices.
        sg = jax.nn.sigmoid(gates)                          # (B, 4H)
        th = jnp.tanh(gates)                                # (B, 4H)
        i = sg[:, 0 * H:1 * H]
        f = sg[:, 1 * H:2 * H]
        g = th[:, 2 * H:3 * H]
        o = sg[:, 3 * H:4 * H]
        c_new = f * c + i * g
        h_new = o * jnp.tanh(c_new)
        return h_new, c_new

    z = jnp.zeros((B, H), jnp.float32)
    h1 = c1 = h2 = c2 = z
    outs = []
    # T is static -> fully unrolled; per-step h2 stays live in vregs (no scratch).
    for t in range(T):
        # layer 1: only the recurrent matmul remains on the serial chain
        g1 = xp[t * B:(t + 1) * B, :] + jnp.dot(h1, whh0,
                                                preferred_element_type=jnp.float32)
        h1, c1 = activate(g1, c1)
        # TODO(synk): nn.LSTM inter-layer dropout(p=0.5) is train-only; inference omits it.
        # layer 2: two independent small matmuls (overlappable), no per-step concat
        g2 = (jnp.dot(h1, wih1, preferred_element_type=jnp.float32)
              + jnp.dot(h2, whh1, preferred_element_type=jnp.float32) + b1)
        h2, c2 = activate(g2, c2)
        outs.append(h2)

    # ---- attention over the time axis (softmax over seq_len) ----
    L = jnp.stack(outs, axis=0)                             # (T, B, H), live values
    # attn_w is broadcast to all 128 lanes in the wrapper, so every lane of the
    # matmul result carries the score -> one MXU op instead of T XLU reductions.
    e = jnp.tanh(jnp.dot(L.reshape(T * B, H), attn_w_ref[...],
                         preferred_element_type=jnp.float32)
                 + attn_b_ref[...])                         # (T*B, 128)
    e = e.reshape(T, B, _LANE)
    m = jnp.max(e, axis=0, keepdims=True)
    p = jnp.exp(e - m)
    a = p / jnp.sum(p, axis=0, keepdims=True)               # exact softmax over T
    ctx = jnp.sum(L * a[:, :, :H], axis=0)                  # (B, H)

    # lane-dense head: lin_w zero-padded to (H, 128); wrapper slices [:, :2]
    out_ref[...] = (jnp.dot(ctx, lin_w_ref[...], preferred_element_type=jnp.float32)
                    + lin_b_ref[...])


@jax.jit
def lstm_predictor_with_attention(x, params):
    """x: (batch, seq_len, n_features) float32 -> (batch, 2) float32."""
    B, T, F = x.shape
    H = params['whh0'].shape[0]

    # pad batch to a full sublane tile so every vreg op uses all 8 sublanes
    B_pad = ((B + _SUBLANE - 1) // _SUBLANE) * _SUBLANE
    x_p = jnp.pad(x, ((0, B_pad - B), (0, 0), (0, 0)))
    x_flat = jnp.transpose(x_p, (1, 0, 2)).reshape(T * B_pad, F)   # (T*B_pad, F)

    # lane-dense head: pad the 2-wide output projection to a full 128-lane slab
    n_out = params['lin_w'].shape[1]
    lin_w = jnp.pad(params['lin_w'], ((0, 0), (0, _LANE - n_out)))
    lin_b = jnp.pad(params['lin_b'], ((0, 0), (0, _LANE - n_out)))
    # attention weight broadcast across all 128 lanes -> score lands in every lane
    attn_w_mat = jnp.tile(params['attn_w'].T, (1, _LANE))          # (H, 128)

    inputs = (x_flat,
              params['wih0'], params['b0'], params['whh0'],
              params['wih1'], params['whh1'], params['b1'],
              attn_w_mat, params['attn_b'],
              lin_w, lin_b)
    vmem = pl.BlockSpec(memory_space=pltpu.MemorySpace.VMEM)
    out = pl.pallas_call(
        _lstm_attention_kernel,
        out_shape=jax.ShapeDtypeStruct((B_pad, _LANE), jnp.float32),
        in_specs=[vmem] * len(inputs),
        out_specs=vmem,
    )(*inputs)
    return out[:B, :n_out]


def init_params(key, n_features, n_hidden):
    """Deterministic init mimicking PyTorch's U(-1/sqrt(H), 1/sqrt(H))."""
    H = n_hidden
    k = 1.0 / math.sqrt(H)
    keys = jax.random.split(key, 12)
    u = lambda kk, shape: jax.random.uniform(kk, shape, jnp.float32, -k, k)
    wih0 = u(keys[0], (4 * H, n_features))      # weight_ih_l0
    whh0 = u(keys[1], (4 * H, H))               # weight_hh_l0
    bih0 = u(keys[2], (4 * H,)); bhh0 = u(keys[3], (4 * H,))
    wih1 = u(keys[4], (4 * H, H))               # weight_ih_l1
    whh1 = u(keys[5], (4 * H, H))               # weight_hh_l1
    bih1 = u(keys[6], (4 * H,)); bhh1 = u(keys[7], (4 * H,))
    attn_w = u(keys[8], (1, H)); attn_b = u(keys[9], (1,))
    lin_w = u(keys[10], (2, H)); lin_b = u(keys[11], (2,))
    return {
        'wih0': wih0.T,                                     # (F, 4H)
        'whh0': whh0.T,                                     # (H, 4H)
        'b0': (bih0 + bhh0).reshape(1, 4 * H),
        'wih1': wih1.T,                                     # (H, 4H)
        'whh1': whh1.T,                                     # (H, 4H)
        'b1': (bih1 + bhh1).reshape(1, 4 * H),
        'attn_w': attn_w,                                   # (1, H)
        'attn_b': attn_b.reshape(1, 1),
        'lin_w': lin_w.T,                                   # (H, 2)
        'lin_b': lin_b.reshape(1, 2),
    }


def reference(x, p):
    """Pure-JAX reference with identical semantics (for validation)."""
    B, T, F = x.shape
    H = p['whh0'].shape[0]

    def cell(x_t, h, c, wih, whh, b):
        gates = x_t @ wih + h @ whh + b
        i = jax.nn.sigmoid(gates[:, :H])
        f = jax.nn.sigmoid(gates[:, H:2 * H])
        g = jnp.tanh(gates[:, 2 * H:3 * H])
        o = jax.nn.sigmoid(gates[:, 3 * H:])
        c = f * c + i * g
        return o * jnp.tanh(c), c

    h1 = c1 = h2 = c2 = jnp.zeros((B, H), jnp.float32)
    outs = []
    for t in range(T):
        h1, c1 = cell(x[:, t], h1, c1, p['wih0'], p['whh0'], p['b0'])
        h2, c2 = cell(h1, h2, c2, p['wih1'], p['whh1'], p['b1'])
        outs.append(h2)
    L = jnp.stack(outs, axis=1)                             # (B, T, H)
    e = jnp.tanh(jnp.einsum('bth,h->bt', L, p['attn_w'][0]) + p['attn_b'][0, 0])
    a = jax.nn.softmax(e, axis=1)
    ctx = jnp.sum(L * a[:, :, None], axis=1)
    return ctx @ p['lin_w'] + p['lin_b']


if __name__ == "__main__":
    n_features, n_hidden, seq_len, batch = 4, 32, 8, 2
    key = jax.random.PRNGKey(0)
    kx, kp = jax.random.split(key)
    x = jax.random.normal(kx, (batch, seq_len, n_features), jnp.float32)
    params = init_params(kp, n_features, n_hidden)

    y = lstm_predictor_with_attention(x, params)
    y = jax.block_until_ready(y)

    y_ref = reference(x, params)
    assert y.shape == (batch, 2), y.shape
    assert jnp.allclose(y, y_ref, atol=1e-4, rtol=1e-4), (y, y_ref)
    print("KERNEL_OK")
</pallas_src>

<mosaic_0001>
module attributes {stable_mosaic.version = 11 : i64} {
  func.func @_lstm_attention_kernel(%arg0: memref<64x4xf32, #tpu.memory_space<vmem>>, %arg1: memref<4x128xf32, #tpu.memory_space<vmem>>, %arg2: memref<1x128xf32, #tpu.memory_space<vmem>>, %arg3: memref<32x128xf32, #tpu.memory_space<vmem>>, %arg4: memref<32x128xf32, #tpu.memory_space<vmem>>, %arg5: memref<32x128xf32, #tpu.memory_space<vmem>>, %arg6: memref<1x128xf32, #tpu.memory_space<vmem>>, %arg7: memref<32x128xf32, #tpu.memory_space<vmem>>, %arg8: memref<1x1xf32, #tpu.memory_space<vmem>>, %arg9: memref<32x128xf32, #tpu.memory_space<vmem>>, %arg10: memref<1x128xf32, #tpu.memory_space<vmem>>, %arg11: memref<8x128xf32, #tpu.memory_space<vmem>>) attributes {dimension_semantics = [], scalar_prefetch = 0 : i64, scratch_operands = 0 : i64, tpu.core_type = #tpu.core_type<tc>} {
    %c0 = arith.constant 0 : index
    %c0_0 = arith.constant 0 : index
    %0 = vector.load %arg3[%c0, %c0_0] : memref<32x128xf32, #tpu.memory_space<vmem>>, vector<32x128xf32>
    %c0_1 = arith.constant 0 : index
    %c0_2 = arith.constant 0 : index
    %1 = vector.load %arg4[%c0_1, %c0_2] : memref<32x128xf32, #tpu.memory_space<vmem>>, vector<32x128xf32>
    %c0_3 = arith.constant 0 : index
    %c0_4 = arith.constant 0 : index
    %2 = vector.load %arg5[%c0_3, %c0_4] : memref<32x128xf32, #tpu.memory_space<vmem>>, vector<32x128xf32>
    %c0_5 = arith.constant 0 : index
    %c0_6 = arith.constant 0 : index
    %3 = vector.load %arg6[%c0_5, %c0_6] : memref<1x128xf32, #tpu.memory_space<vmem>>, vector<1x128xf32>
    %4 = vector.shape_cast %3 : vector<1x128xf32> to vector<1x128xf32>
    %5 = vector.broadcast %4 : vector<1x128xf32> to vector<8x128xf32>
    %c0_7 = arith.constant 0 : index
    %c0_8 = arith.constant 0 : index
    %6 = vector.load %arg0[%c0_7, %c0_8] : memref<64x4xf32, #tpu.memory_space<vmem>>, vector<64x4xf32>
    %c0_9 = arith.constant 0 : index
    %c0_10 = arith.constant 0 : index
    %7 = vector.load %arg1[%c0_9, %c0_10] : memref<4x128xf32, #tpu.memory_space<vmem>>, vector<4x128xf32>
    %cst = arith.constant dense<0.000000e+00> : vector<64x128xf32>
    %8 = tpu.matmul %6, %7, %cst {dimension_numbers = #tpu.dot_dimension_numbers<[1], [0], [0], [1], [0, 0, 1, 1], [], []>} : vector<64x4xf32>, vector<4x128xf32>, vector<64x128xf32> -> vector<64x128xf32>
    %c0_11 = arith.constant 0 : index
    %c0_12 = arith.constant 0 : index
    %9 = vector.load %arg2[%c0_11, %c0_12] : memref<1x128xf32, #tpu.memory_space<vmem>>, vector<1x128xf32>
    %10 = vector.broadcast %9 : vector<1x128xf32> to vector<64x128xf32>
    %11 = arith.addf %8, %10 : vector<64x128xf32>
    %cst_13 = arith.constant 0.000000e+00 : f32
    %12 = vector.broadcast %cst_13 : f32 to vector<8x32xf32>
    %13 = vector.extract_strided_slice %11 {offsets = [0, 0], sizes = [8, 128], strides = [1, 1]} : vector<64x128xf32> to vector<8x128xf32>
    %cst_14 = arith.constant dense<0.000000e+00> : vector<8x128xf32>
    %14 = tpu.matmul %12, %0, %cst_14 {dimension_numbers = #tpu.dot_dimension_numbers<[1], [0], [0], [1], [0, 0, 1, 1], [], []>} : vector<8x32xf32>, vector<32x128xf32>, vector<8x128xf32> -> vector<8x128xf32>
    %15 = arith.addf %13, %14 : vector<8x128xf32>
    %16 = arith.negf %15 : vector<8x128xf32>
    %17 = math.exp %16 : vector<8x128xf32>
    %cst_15 = arith.constant 1.000000e+00 : f32
    %18 = vector.broadcast %cst_15 : f32 to vector<8x128xf32>
    %19 = arith.addf %18, %17 : vector<8x128xf32>
    %20 = arith.divf %18, %19 : vector<8x128xf32>
    %21 = math.tanh %15 : vector<8x128xf32>
    %22 = vector.extract_strided_slice %20 {offsets = [0, 0], sizes = [8, 32], strides = [1, 1]} : vector<8x128xf32> to vector<8x32xf32>
    %23 = vector.extract_strided_slice %20 {offsets = [0, 32], sizes = [8, 32], strides = [1, 1]} : vector<8x128xf32> to vector<8x32xf32>
    %24 = vector.extract_strided_slice %21 {offsets = [0, 64], sizes = [8, 32], strides = [1, 1]} : vector<8x128xf32> to vector<8x32xf32>
    %25 = vector.extract_strided_slice %20 {offsets = [0, 96], sizes = [8, 32], strides = [1, 1]} : vector<8x128xf32> to vector<8x32xf32>
    %26 = arith.mulf %23, %12 : vector<8x32xf32>
    %27 = arith.mulf %22, %24 : vector<8x32xf32>
    %28 = arith.addf %26, %27 : vector<8x32xf32>
    %29 = math.tanh %28 : vector<8x32xf32>
    %30 = arith.mulf %25, %29 : vector<8x32xf32>
    %cst_16 = arith.constant dense<0.000000e+00> : vector<8x128xf32>
    %31 = tpu.matmul %30, %1, %cst_16 {dimension_numbers = #tpu.dot_dimension_numbers<[1], [0], [0], [1], [0, 0, 1, 1], [], []>} : vector<8x32xf32>, vector<32x128xf32>, vector<8x128xf32> -> vector<8x128xf32>
    %cst_17 = arith.constant dense<0.000000e+00> : vector<8x128xf32>
    %32 = tpu.matmul %12, %2, %cst_17 {dimension_numbers = #tpu.dot_dimension_numbers<[1], [0], [0], [1], [0, 0, 1, 1], [], []>} : vector<8x32xf32>, vector<32x128xf32>, vector<8x128xf32> -> vector<8x128xf32>
    %33 = arith.addf %31, %32 : vector<8x128xf32>
    %34 = arith.addf %33, %5 : vector<8x128xf32>
    %35 = arith.negf %34 : vector<8x128xf32>
    %36 = math.exp %35 : vector<8x128xf32>
    %cst_18 = arith.constant 1.000000e+00 : f32
    %37 = vector.broadcast %cst_18 : f32 to vector<8x128xf32>
    %38 = arith.addf %37, %36 : vector<8x128xf32>
    %39 = arith.divf %37, %38 : vector<8x128xf32>
    %40 = math.tanh %34 : vector<8x128xf32>
    %41 = vector.extract_strided_slice %39 {offsets = [0, 0], sizes = [8, 32], strides = [1, 1]} : vector<8x128xf32> to vector<8x32xf32>
    %42 = vector.extract_strided_slice %39 {offsets = [0, 32], sizes = [8, 32], strides = [1, 1]} : vector<8x128xf32> to vector<8x32xf32>
    %43 = vector.extract_strided_slice %40 {offsets = [0, 64], sizes = [8, 32], strides = [1, 1]} : vector<8x128xf32> to vector<8x32xf32>
    %44 = vector.extract_strided_slice %39 {offsets = [0, 96], sizes = [8, 32], strides = [1, 1]} : vector<8x128xf32> to vector<8x32xf32>
    %45 = arith.mulf %42, %12 : vector<8x32xf32>
    %46 = arith.mulf %41, %43 : vector<8x32xf32>
    %47 = arith.addf %45, %46 : vector<8x32xf32>
    %48 = math.tanh %47 : vector<8x32xf32>
    %49 = arith.mulf %44, %48 : vector<8x32xf32>
    %50 = vector.extract_strided_slice %11 {offsets = [8, 0], sizes = [8, 128], strides = [1, 1]} : vector<64x128xf32> to vector<8x128xf32>
    %cst_19 = arith.constant dense<0.000000e+00> : vector<8x128xf32>
    %51 = tpu.matmul %30, %0, %cst_19 {dimension_numbers = #tpu.dot_dimension_numbers<[1], [0], [0], [1], [0, 0, 1, 1], [], []>} : vector<8x32xf32>, vector<32x128xf32>, vector<8x128xf32> -> vector<8x128xf32>
    %52 = arith.addf %50, %51 : vector<8x128xf32>
    %53 = arith.negf %52 : vector<8x128xf32>
    %54 = math.exp %53 : vector<8x128xf32>
    %cst_20 = arith.constant 1.000000e+00 : f32
    %55 = vector.broadcast %cst_20 : f32 to vector<8x128xf32>
    %56 = arith.addf %55, %54 : vector<8x128xf32>
    %57 = arith.divf %55, %56 : vector<8x128xf32>
    %58 = math.tanh %52 : vector<8x128xf32>
    %59 = vector.extract_strided_slice %57 {offsets = [0, 0], sizes = [8, 32], strides = [1, 1]} : vector<8x128xf32> to vector<8x32xf32>
    %60 = vector.extract_strided_slice %57 {offsets = [0, 32], sizes = [8, 32], strides = [1, 1]} : vector<8x128xf32> to vector<8x32xf32>
    %61 = vector.extract_strided_slice %58 {offsets = [0, 64], sizes = [8, 32], strides = [1, 1]} : vector<8x128xf32> to vector<8x32xf32>
    %62 = vector.extract_strided_slice %57 {offsets = [0, 96], sizes = [8, 32], strides = [1, 1]} : vector<8x128xf32> to vector<8x32xf32>
    %63 = arith.mulf %60, %28 : vector<8x32xf32>
    %64 = arith.mulf %59, %61 : vector<8x32xf32>
    %65 = arith.addf %63, %64 : vector<8x32xf32>
    %66 = math.tanh %65 : vector<8x32xf32>
    %67 = arith.mulf %62, %66 : vector<8x32xf32>
    %cst_21 = arith.constant dense<0.000000e+00> : vector<8x128xf32>
    %68 = tpu.matmul %67, %1, %cst_21 {dimension_numbers = #tpu.dot_dimension_numbers<[1], [0], [0], [1], [0, 0, 1, 1], [], []>} : vector<8x32xf32>, vector<32x128xf32>, vector<8x128xf32> -> vector<8x128xf32>
    %cst_22 = arith.constant dense<0.000000e+00> : vector<8x128xf32>
    %69 = tpu.matmul %49, %2, %cst_22 {dimension_numbers = #tpu.dot_dimension_numbers<[1], [0], [0], [1], [0, 0, 1, 1], [], []>} : vector<8x32xf32>, vector<32x128xf32>, vector<8x128xf32> -> vector<8x128xf32>
    %70 = arith.addf %68, %69 : vector<8x128xf32>
    %71 = arith.addf %70, %5 : vector<8x128xf32>
    %72 = arith.negf %71 : vector<8x128xf32>
    %73 = math.exp %72 : vector<8x128xf32>
    %cst_23 = arith.constant 1.000000e+00 : f32
    %74 = vector.broadcast %cst_23 : f32 to vector<8x128xf32>
    %75 = arith.addf %74, %73 : vector<8x128xf32>
    %76 = arith.divf %74, %75 : vector<8x128xf32>
    %77 = math.tanh %71 : vector<8x128xf32>
    %78 = vector.extract_strided_slice %76 {offsets = [0, 0], sizes = [8, 32], strides = [1, 1]} : vector<8x128xf32> to vector<8x32xf32>
    %79 = vector.extract_strided_slice %76 {offsets = [0, 32], sizes = [8, 32], strides = [1, 1]} : vector<8x128xf32> to vector<8x32xf32>
    %80 = vector.extract_strided_slice %77 {offsets = [0, 64], sizes = [8, 32], strides = [1, 1]} : vector<8x128xf32> to vector<8x32xf32>
    %81 = vector.extract_strided_slice %76 {offsets = [0, 96], sizes = [8, 32], strides = [1, 1]} : vector<8x128xf32> to vector<8x32xf32>
    %82 = arith.mulf %79, %47 : vector<8x32xf32>
    %83 = arith.mulf %78, %80 : vector<8x32xf32>
    %84 = arith.addf %82, %83 : vector<8x32xf32>
    %85 = math.tanh %84 : vector<8x32xf32>
    %86 = arith.mulf %81, %85 : vector<8x32xf32>
    %87 = vector.extract_strided_slice %11 {offsets = [16, 0], sizes = [8, 128], strides = [1, 1]} : vector<64x128xf32> to vector<8x128xf32>
    %cst_24 = arith.constant dense<0.000000e+00> : vector<8x128xf32>
    %88 = tpu.matmul %67, %0, %cst_24 {dimension_numbers = #tpu.dot_dimension_numbers<[1], [0], [0], [1], [0, 0, 1, 1], [], []>} : vector<8x32xf32>, vector<32x128xf32>, vector<8x128xf32> -> vector<8x128xf32>
    %89 = arith.addf %87, %88 : vector<8x128xf32>
    %90 = arith.negf %89 : vector<8x128xf32>
    %91 = math.exp %90 : vector<8x128xf32>
    %cst_25 = arith.constant 1.000000e+00 : f32
    %92 = vector.broadcast %cst_25 : f32 to vector<8x128xf32>
    %93 = arith.addf %92, %91 : vector<8x128xf32>
    %94 = arith.divf %92, %93 : vector<8x128xf32>
    %95 = math.tanh %89 : vector<8x128xf32>
    %96 = vector.extract_strided_slice %94 {offsets = [0, 0], sizes = [8, 32], strides = [1, 1]} : vector<8x128xf32> to vector<8x32xf32>
    %97 = vector.extract_strided_slice %94 {offsets = [0, 32], sizes = [8, 32], strides = [1, 1]} : vector<8x128xf32> to vector<8x32xf32>
    %98 = vector.extract_strided_slice %95 {offsets = [0, 64], sizes = [8, 32], strides = [1, 1]} : vector<8x128xf32> to vector<8x32xf32>
    %99 = vector.extract_strided_slice %94 {offsets = [0, 96], sizes = [8, 32], strides = [1, 1]} : vector<8x128xf32> to vector<8x32xf32>
    %100 = arith.mulf %97, %65 : vector<8x32xf32>
    %101 = arith.mulf %96, %98 : vector<8x32xf32>
    %102 = arith.addf %100, %101 : vector<8x32xf32>
    %103 = math.tanh %102 : vector<8x32xf32>
    %104 = arith.mulf %99, %103 : vector<8x32xf32>
    %cst_26 = arith.constant dense<0.000000e+00> : vector<8x128xf32>
    %105 = tpu.matmul %104, %1, %cst_26 {dimension_numbers = #tpu.dot_dimension_numbers<[1], [0], [0], [1], [0, 0, 1, 1], [], []>} : vector<8x32xf32>, vector<32x128xf32>, vector<8x128xf32> -> vector<8x128xf32>
    %cst_27 = arith.constant dense<0.000000e+00> : vector<8x128xf32>
    %106 = tpu.matmul %86, %2, %cst_27 {dimension_numbers = #tpu.dot_dimension_numbers<[1], [0], [0], [1], [0, 0, 1, 1], [], []>} : vector<8x32xf32>, vector<32x128xf32>, vector<8x128xf32> -> vector<8x128xf32>
    %107 = arith.addf %105, %106 : vector<8x128xf32>
    %108 = arith.addf %107, %5 : vector<8x128xf32>
    %109 = arith.negf %108 : vector<8x128xf32>
    %110 = math.exp %109 : vector<8x128xf32>
    %cst_28 = arith.constant 1.000000e+00 : f32
    %111 = vector.broadcast %cst_28 : f32 to vector<8x128xf32>
    %112 = arith.addf %111, %110 : vector<8x128xf32>
    %113 = arith.divf %111, %112 : vector<8x128xf32>
    %114 = math.tanh %108 : vector<8x128xf32>
    %115 = vector.extract_strided_slice %113 {offsets = [0, 0], sizes = [8, 32], strides = [1, 1]} : vector<8x128xf32> to vector<8x32xf32>
    %116 = vector.extract_strided_slice %113 {offsets = [0, 32], sizes = [8, 32], strides = [1, 1]} : vector<8x128xf32> to vector<8x32xf32>
    %117 = vector.extract_strided_slice %114 {offsets = [0, 64], sizes = [8, 32], strides = [1, 1]} : vector<8x128xf32> to vector<8x32xf32>
    %118 = vector.extract_strided_slice %113 {offsets = [0, 96], sizes = [8, 32], strides = [1, 1]} : vector<8x128xf32> to vector<8x32xf32>
    %119 = arith.mulf %116, %84 : vector<8x32xf32>
    %120 = arith.mulf %115, %117 : vector<8x32xf32>
    %121 = arith.addf %119, %120 : vector<8x32xf32>
    %122 = math.tanh %121 : vector<8x32xf32>
    %123 = arith.mulf %118, %122 : vector<8x32xf32>
    %124 = vector.extract_strided_slice %11 {offsets = [24, 0], sizes = [8, 128], strides = [1, 1]} : vector<64x128xf32> to vector<8x128xf32>
    %cst_29 = arith.constant dense<0.000000e+00> : vector<8x128xf32>
    %125 = tpu.matmul %104, %0, %cst_29 {dimension_numbers = #tpu.dot_dimension_numbers<[1], [0], [0], [1], [0, 0, 1, 1], [], []>} : vector<8x32xf32>, vector<32x128xf32>, vector<8x128xf32> -> vector<8x128xf32>
    %126 = arith.addf %124, %125 : vector<8x128xf32>
    %127 = arith.negf %126 : vector<8x128xf32>
    %128 = math.exp %127 : vector<8x128xf32>
    %cst_30 = arith.constant 1.000000e+00 : f32
    %129 = vector.broadcast %cst_30 : f32 to vector<8x128xf32>
    %130 = arith.addf %129, %128 : vector<8x128xf32>
    %131 = arith.divf %129, %130 : vector<8x128xf32>
    %132 = math.tanh %126 : vector<8x128xf32>
    %133 = vector.extract_strided_slice %131 {offsets = [0, 0], sizes = [8, 32], strides = [1, 1]} : vector<8x128xf32> to vector<8x32xf32>
    %134 = vector.extract_strided_slice %131 {offsets = [0, 32], sizes = [8, 32], strides = [1, 1]} : vector<8x128xf32> to vector<8x32xf32>
    %135 = vector.extract_strided_slice %132 {offsets = [0, 64], sizes = [8, 32], strides = [1, 1]} : vector<8x128xf32> to vector<8x32xf32>
    %136 = vector.extract_strided_slice %131 {offsets = [0, 96], sizes = [8, 32], strides = [1, 1]} : vector<8x128xf32> to vector<8x32xf32>
    %137 = arith.mulf %134, %102 : vector<8x32xf32>
    %138 = arith.mulf %133, %135 : vector<8x32xf32>
    %139 = arith.addf %137, %138 : vector<8x32xf32>
    %140 = math.tanh %139 : vector<8x32xf32>
    %141 = arith.mulf %136, %140 : vector<8x32xf32>
    %cst_31 = arith.constant dense<0.000000e+00> : vector<8x128xf32>
    %142 = tpu.matmul %141, %1, %cst_31 {dimension_numbers = #tpu.dot_dimension_numbers<[1], [0], [0], [1], [0, 0, 1, 1], [], []>} : vector<8x32xf32>, vector<32x128xf32>, vector<8x128xf32> -> vector<8x128xf32>
    %cst_32 = arith.constant dense<0.000000e+00> : vector<8x128xf32>
    %143 = tpu.matmul %123, %2, %cst_32 {dimension_numbers = #tpu.dot_dimension_numbers<[1], [0], [0], [1], [0, 0, 1, 1], [], []>} : vector<8x32xf32>, vector<32x128xf32>, vector<8x128xf32> -> vector<8x128xf32>
    %144 = arith.addf %142, %143 : vector<8x128xf32>
    %145 = arith.addf %144, %5 : vector<8x128xf32>
    %146 = arith.negf %145 : vector<8x128xf32>
    %147 = math.exp %146 : vector<8x128xf32>
    %cst_33 = arith.constant 1.000000e+00 : f32
    %148 = vector.broadcast %cst_33 : f32 to vector<8x128xf32>
    %149 = arith.addf %148, %147 : vector<8x128xf32>
    %150 = arith.divf %148, %149 : vector<8x128xf32>
    %151 = math.tanh %145 : vector<8x128xf32>
    %152 = vector.extract_strided_slice %150 {offsets = [0, 0], sizes = [8, 32], strides = [1, 1]} : vector<8x128xf32> to vector<8x32xf32>
    %153 = vector.extract_strided_slice %150 {offsets = [0, 32], sizes = [8, 32], strides = [1, 1]} : vector<8x128xf32> to vector<8x32xf32>
    %154 = vector.extract_strided_slice %151 {offsets = [0, 64], sizes = [8, 32], strides = [1, 1]} : vector<8x128xf32> to vector<8x32xf32>
    %155 = vector.extract_strided_slice %150 {offsets = [0, 96], sizes = [8, 32], strides = [1, 1]} : vector<8x128xf32> to vector<8x32xf32>
    %156 = arith.mulf %153, %121 : vector<8x32xf32>
    %157 = arith.mulf %152, %154 : vector<8x32xf32>
    %158 = arith.addf %156, %157 : vector<8x32xf32>
    %159 = math.tanh %158 : vector<8x32xf32>
    %160 = arith.mulf %155, %159 : vector<8x32xf32>
    %161 = vector.extract_strided_slice %11 {offsets = [32, 0], sizes = [8, 128], strides = [1, 1]} : vector<64x128xf32> to vector<8x128xf32>
    %cst_34 = arith.constant dense<0.000000e+00> : vector<8x128xf32>
    %162 = tpu.matmul %141, %0, %cst_34 {dimension_numbers = #tpu.dot_dimension_numbers<[1], [0], [0], [1], [0, 0, 1, 1], [], []>} : vector<8x32xf32>, vector<32x128xf32>, vector<8x128xf32> -> vector<8x128xf32>
    %163 = arith.addf %161, %162 : vector<8x128xf32>
    %164 = arith.negf %163 : vector<8x128xf32>
    %165 = math.exp %164 : vector<8x128xf32>
    %cst_35 = arith.constant 1.000000e+00 : f32
    %166 = vector.broadcast %cst_35 : f32 to vector<8x128xf32>
    %167 = arith.addf %166, %165 : vector<8x128xf32>
    %168 = arith.divf %166, %167 : vector<8x128xf32>
    %169 = math.tanh %163 : vector<8x128xf32>
    %170 = vector.extract_strided_slice %168 {offsets = [0, 0], sizes = [8, 32], strides = [1, 1]} : vector<8x128xf32> to vector<8x32xf32>
    %171 = vector.extract_strided_slice %168 {offsets = [0, 32], sizes = [8, 32], strides = [1, 1]} : vector<8x128xf32> to vector<8x32xf32>
    %172 = vector.extract_strided_slice %169 {offsets = [0, 64], sizes = [8, 32], strides = [1, 1]} : vector<8x128xf32> to vector<8x32xf32>
    %173 = vector.extract_strided_slice %168 {offsets = [0, 96], sizes = [8, 32], strides = [1, 1]} : vector<8x128xf32> to vector<8x32xf32>
    %174 = arith.mulf %171, %139 : vector<8x32xf32>
    %175 = arith.mulf %170, %172 : vector<8x32xf32>
    %176 = arith.addf %174, %175 : vector<8x32xf32>
    %177 = math.tanh %176 : vector<8x32xf32>
    %178 = arith.mulf %173, %177 : vector<8x32xf32>
    %cst_36 = arith.constant dense<0.000000e+00> : vector<8x128xf32>
    %179 = tpu.matmul %178, %1, %cst_36 {dimension_numbers = #tpu.dot_dimension_numbers<[1], [0], [0], [1], [0, 0, 1, 1], [], []>} : vector<8x32xf32>, vector<32x128xf32>, vector<8x128xf32> -> vector<8x128xf32>
    %cst_37 = arith.constant dense<0.000000e+00> : vector<8x128xf32>
    %180 = tpu.matmul %160, %2, %cst_37 {dimension_numbers = #tpu.dot_dimension_numbers<[1], [0], [0], [1], [0, 0, 1, 1], [], []>} : vector<8x32xf32>, vector<32x128xf32>, vector<8x128xf32> -> vector<8x128xf32>
    %181 = arith.addf %179, %180 : vector<8x128xf32>
    %182 = arith.addf %181, %5 : vector<8x128xf32>
    %183 = arith.negf %182 : vector<8x128xf32>
    %184 = math.exp %183 : vector<8x128xf32>
    %cst_38 = arith.constant 1.000000e+00 : f32
    %185 = vector.broadcast %cst_38 : f32 to vector<8x128xf32>
    %186 = arith.addf %185, %184 : vector<8x128xf32>
    %187 = arith.divf %185, %186 : vector<8x128xf32>
    %188 = math.tanh %182 : vector<8x128xf32>
    %189 = vector.extract_strided_slice %187 {offsets = [0, 0], sizes = [8, 32], strides = [1, 1]} : vector<8x128xf32> to vector<8x32xf32>
    %190 = vector.extract_strided_slice %187 {offsets = [0, 32], sizes = [8, 32], strides = [1, 1]} : vector<8x128xf32> to vector<8x32xf32>
    %191 = vector.extract_strided_slice %188 {offsets = [0, 64], sizes = [8, 32], strides = [1, 1]} : vector<8x128xf32> to vector<8x32xf32>
    %192 = vector.extract_strided_slice %187 {offsets = [0, 96], sizes = [8, 32], strides = [1, 1]} : vector<8x128xf32> to vector<8x32xf32>
    %193 = arith.mulf %190, %158 : vector<8x32xf32>
    %194 = arith.mulf %189, %191 : vector<8x32xf32>
    %195 = arith.addf %193, %194 : vector<8x32xf32>
    %196 = math.tanh %195 : vector<8x32xf32>
    %197 = arith.mulf %192, %196 : vector<8x32xf32>
    %198 = vector.extract_strided_slice %11 {offsets = [40, 0], sizes = [8, 128], strides = [1, 1]} : vector<64x128xf32> to vector<8x128xf32>
    %cst_39 = arith.constant dense<0.000000e+00> : vector<8x128xf32>
    %199 = tpu.matmul %178, %0, %cst_39 {dimension_numbers = #tpu.dot_dimension_numbers<[1], [0], [0], [1], [0, 0, 1, 1], [], []>} : vector<8x32xf32>, vector<32x128xf32>, vector<8x128xf32> -> vector<8x128xf32>
    %200 = arith.addf %198, %199 : vector<8x128xf32>
    %201 = arith.negf %200 : vector<8x128xf32>
    %202 = math.exp %201 : vector<8x128xf32>
    %cst_40 = arith.constant 1.000000e+00 : f32
    %203 = vector.broadcast %cst_40 : f32 to vector<8x128xf32>
    %204 = arith.addf %203, %202 : vector<8x128xf32>
    %205 = arith.divf %203, %204 : vector<8x128xf32>
    %206 = math.tanh %200 : vector<8x128xf32>
    %207 = vector.extract_strided_slice %205 {offsets = [0, 0], sizes = [8, 32], strides = [1, 1]} : vector<8x128xf32> to vector<8x32xf32>
    %208 = vector.extract_strided_slice %205 {offsets = [0, 32], sizes = [8, 32], strides = [1, 1]} : vector<8x128xf32> to vector<8x32xf32>
    %209 = vector.extract_strided_slice %206 {offsets = [0, 64], sizes = [8, 32], strides = [1, 1]} : vector<8x128xf32> to vector<8x32xf32>
    %210 = vector.extract_strided_slice %205 {offsets = [0, 96], sizes = [8, 32], strides = [1, 1]} : vector<8x128xf32> to vector<8x32xf32>
    %211 = arith.mulf %208, %176 : vector<8x32xf32>
    %212 = arith.mulf %207, %209 : vector<8x32xf32>
    %213 = arith.addf %211, %212 : vector<8x32xf32>
    %214 = math.tanh %213 : vector<8x32xf32>
    %215 = arith.mulf %210, %214 : vector<8x32xf32>
    %cst_41 = arith.constant dense<0.000000e+00> : vector<8x128xf32>
    %216 = tpu.matmul %215, %1, %cst_41 {dimension_numbers = #tpu.dot_dimension_numbers<[1], [0], [0], [1], [0, 0, 1, 1], [], []>} : vector<8x32xf32>, vector<32x128xf32>, vector<8x128xf32> -> vector<8x128xf32>
    %cst_42 = arith.constant dense<0.000000e+00> : vector<8x128xf32>
    %217 = tpu.matmul %197, %2, %cst_42 {dimension_numbers = #tpu.dot_dimension_numbers<[1], [0], [0], [1], [0, 0, 1, 1], [], []>} : vector<8x32xf32>, vector<32x128xf32>, vector<8x128xf32> -> vector<8x128xf32>
    %218 = arith.addf %216, %217 : vector<8x128xf32>
    %219 = arith.addf %218, %5 : vector<8x128xf32>
    %220 = arith.negf %219 : vector<8x128xf32>
    %221 = math.exp %220 : vector<8x128xf32>
    %cst_43 = arith.constant 1.000000e+00 : f32
    %222 = vector.broadcast %cst_43 : f32 to vector<8x128xf32>
    %223 = arith.addf %222, %221 : vector<8x128xf32>
    %224 = arith.divf %222, %223 : vector<8x128xf32>
    %225 = math.tanh %219 : vector<8x128xf32>
    %226 = vector.extract_strided_slice %224 {offsets = [0, 0], sizes = [8, 32], strides = [1, 1]} : vector<8x128xf32> to vector<8x32xf32>
    %227 = vector.extract_strided_slice %224 {offsets = [0, 32], sizes = [8, 32], strides = [1, 1]} : vector<8x128xf32> to vector<8x32xf32>
    %228 = vector.extract_strided_slice %225 {offsets = [0, 64], sizes = [8, 32], strides = [1, 1]} : vector<8x128xf32> to vector<8x32xf32>
    %229 = vector.extract_strided_slice %224 {offsets = [0, 96], sizes = [8, 32], strides = [1, 1]} : vector<8x128xf32> to vector<8x32xf32>
    %230 = arith.mulf %227, %195 : vector<8x32xf32>
    %231 = arith.mulf %226, %228 : vector<8x32xf32>
    %232 = arith.addf %230, %231 : vector<8x32xf32>
    %233 = math.tanh %232 : vector<8x32xf32>
    %234 = arith.mulf %229, %233 : vector<8x32xf32>
    %235 = vector.extract_strided_slice %11 {offsets = [48, 0], sizes = [8, 128], strides = [1, 1]} : vector<64x128xf32> to vector<8x128xf32>
    %cst_44 = arith.constant dense<0.000000e+00> : vector<8x128xf32>
    %236 = tpu.matmul %215, %0, %cst_44 {dimension_numbers = #tpu.dot_dimension_numbers<[1], [0], [0], [1], [0, 0, 1, 1], [], []>} : vector<8x32xf32>, vector<32x128xf32>, vector<8x128xf32> -> vector<8x128xf32>
    %237 = arith.addf %235, %236 : vector<8x128xf32>
    %238 = arith.negf %237 : vector<8x128xf32>
    %239 = math.exp %238 : vector<8x128xf32>
    %cst_45 = arith.constant 1.000000e+00 : f32
    %240 = vector.broadcast %cst_45 : f32 to vector<8x128xf32>
    %241 = arith.addf %240, %239 : vector<8x128xf32>
    %242 = arith.divf %240, %241 : vector<8x128xf32>
    %243 = math.tanh %237 : vector<8x128xf32>
    %244 = vector.extract_strided_slice %242 {offsets = [0, 0], sizes = [8, 32], strides = [1, 1]} : vector<8x128xf32> to vector<8x32xf32>
    %245 = vector.extract_strided_slice %242 {offsets = [0, 32], sizes = [8, 32], strides = [1, 1]} : vector<8x128xf32> to vector<8x32xf32>
    %246 = vector.extract_strided_slice %243 {offsets = [0, 64], sizes = [8, 32], strides = [1, 1]} : vector<8x128xf32> to vector<8x32xf32>
    %247 = vector.extract_strided_slice %242 {offsets = [0, 96], sizes = [8, 32], strides = [1, 1]} : vector<8x128xf32> to vector<8x32xf32>
    %248 = arith.mulf %245, %213 : vector<8x32xf32>
    %249 = arith.mulf %244, %246 : vector<8x32xf32>
    %250 = arith.addf %248, %249 : vector<8x32xf32>
    %251 = math.tanh %250 : vector<8x32xf32>
    %252 = arith.mulf %247, %251 : vector<8x32xf32>
    %cst_46 = arith.constant dense<0.000000e+00> : vector<8x128xf32>
    %253 = tpu.matmul %252, %1, %cst_46 {dimension_numbers = #tpu.dot_dimension_numbers<[1], [0], [0], [1], [0, 0, 1, 1], [], []>} : vector<8x32xf32>, vector<32x128xf32>, vector<8x128xf32> -> vector<8x128xf32>
    %cst_47 = arith.constant dense<0.000000e+00> : vector<8x128xf32>
    %254 = tpu.matmul %234, %2, %cst_47 {dimension_numbers = #tpu.dot_dimension_numbers<[1], [0], [0], [1], [0, 0, 1, 1], [], []>} : vector<8x32xf32>, vector<32x128xf32>, vector<8x128xf32> -> vector<8x128xf32>
    %255 = arith.addf %253, %254 : vector<8x128xf32>
    %256 = arith.addf %255, %5 : vector<8x128xf32>
    %257 = arith.negf %256 : vector<8x128xf32>
    %258 = math.exp %257 : vector<8x128xf32>
    %cst_48 = arith.constant 1.000000e+00 : f32
    %259 = vector.broadcast %cst_48 : f32 to vector<8x128xf32>
    %260 = arith.addf %259, %258 : vector<8x128xf32>
    %261 = arith.divf %259, %260 : vector<8x128xf32>
    %262 = math.tanh %256 : vector<8x128xf32>
    %263 = vector.extract_strided_slice %261 {offsets = [0, 0], sizes = [8, 32], strides = [1, 1]} : vector<8x128xf32> to vector<8x32xf32>
    %264 = vector.extract_strided_slice %261 {offsets = [0, 32], sizes = [8, 32], strides = [1, 1]} : vector<8x128xf32> to vector<8x32xf32>
    %265 = vector.extract_strided_slice %262 {offsets = [0, 64], sizes = [8, 32], strides = [1, 1]} : vector<8x128xf32> to vector<8x32xf32>
    %266 = vector.extract_strided_slice %261 {offsets = [0, 96], sizes = [8, 32], strides = [1, 1]} : vector<8x128xf32> to vector<8x32xf32>
    %267 = arith.mulf %264, %232 : vector<8x32xf32>
    %268 = arith.mulf %263, %265 : vector<8x32xf32>
    %269 = arith.addf %267, %268 : vector<8x32xf32>
    %270 = math.tanh %269 : vector<8x32xf32>
    %271 = arith.mulf %266, %270 : vector<8x32xf32>
    %272 = vector.extract_strided_slice %11 {offsets = [56, 0], sizes = [8, 128], strides = [1, 1]} : vector<64x128xf32> to vector<8x128xf32>
    %cst_49 = arith.constant dense<0.000000e+00> : vector<8x128xf32>
    %273 = tpu.matmul %252, %0, %cst_49 {dimension_numbers = #tpu.dot_dimension_numbers<[1], [0], [0], [1], [0, 0, 1, 1], [], []>} : vector<8x32xf32>, vector<32x128xf32>, vector<8x128xf32> -> vector<8x128xf32>
    %274 = arith.addf %272, %273 : vector<8x128xf32>
    %275 = arith.negf %274 : vector<8x128xf32>
    %276 = math.exp %275 : vector<8x128xf32>
    %cst_50 = arith.constant 1.000000e+00 : f32
    %277 = vector.broadcast %cst_50 : f32 to vector<8x128xf32>
    %278 = arith.addf %277, %276 : vector<8x128xf32>
    %279 = arith.divf %277, %278 : vector<8x128xf32>
    %280 = math.tanh %274 : vector<8x128xf32>
    %281 = vector.extract_strided_slice %279 {offsets = [0, 0], sizes = [8, 32], strides = [1, 1]} : vector<8x128xf32> to vector<8x32xf32>
    %282 = vector.extract_strided_slice %279 {offsets = [0, 32], sizes = [8, 32], strides = [1, 1]} : vector<8x128xf32> to vector<8x32xf32>
    %283 = vector.extract_strided_slice %280 {offsets = [0, 64], sizes = [8, 32], strides = [1, 1]} : vector<8x128xf32> to vector<8x32xf32>
    %284 = vector.extract_strided_slice %279 {offsets = [0, 96], sizes = [8, 32], strides = [1, 1]} : vector<8x128xf32> to vector<8x32xf32>
    %285 = arith.mulf %282, %250 : vector<8x32xf32>
    %286 = arith.mulf %281, %283 : vector<8x32xf32>
    %287 = arith.addf %285, %286 : vector<8x32xf32>
    %288 = math.tanh %287 : vector<8x32xf32>
    %289 = arith.mulf %284, %288 : vector<8x32xf32>
    %cst_51 = arith.constant dense<0.000000e+00> : vector<8x128xf32>
    %290 = tpu.matmul %289, %1, %cst_51 {dimension_numbers = #tpu.dot_dimension_numbers<[1], [0], [0], [1], [0, 0, 1, 1], [], []>} : vector<8x32xf32>, vector<32x128xf32>, vector<8x128xf32> -> vector<8x128xf32>
    %cst_52 = arith.constant dense<0.000000e+00> : vector<8x128xf32>
    %291 = tpu.matmul %271, %2, %cst_52 {dimension_numbers = #tpu.dot_dimension_numbers<[1], [0], [0], [1], [0, 0, 1, 1], [], []>} : vector<8x32xf32>, vector<32x128xf32>, vector<8x128xf32> -> vector<8x128xf32>
    %292 = arith.addf %290, %291 : vector<8x128xf32>
    %293 = arith.addf %292, %5 : vector<8x128xf32>
    %294 = arith.negf %293 : vector<8x128xf32>
    %295 = math.exp %294 : vector<8x128xf32>
    %cst_53 = arith.constant 1.000000e+00 : f32
    %296 = vector.broadcast %cst_53 : f32 to vector<8x128xf32>
    %297 = arith.addf %296, %295 : vector<8x128xf32>
    %298 = arith.divf %296, %297 : vector<8x128xf32>
    %299 = math.tanh %293 : vector<8x128xf32>
    %300 = vector.extract_strided_slice %298 {offsets = [0, 0], sizes = [8, 32], strides = [1, 1]} : vector<8x128xf32> to vector<8x32xf32>
    %301 = vector.extract_strided_slice %298 {offsets = [0, 32], sizes = [8, 32], strides = [1, 1]} : vector<8x128xf32> to vector<8x32xf32>
    %302 = vector.extract_strided_slice %299 {offsets = [0, 64], sizes = [8, 32], strides = [1, 1]} : vector<8x128xf32> to vector<8x32xf32>
    %303 = vector.extract_strided_slice %298 {offsets = [0, 96], sizes = [8, 32], strides = [1, 1]} : vector<8x128xf32> to vector<8x32xf32>
    %304 = arith.mulf %301, %269 : vector<8x32xf32>
    %305 = arith.mulf %300, %302 : vector<8x32xf32>
    %306 = arith.addf %304, %305 : vector<8x32xf32>
    %307 = math.tanh %306 : vector<8x32xf32>
    %308 = arith.mulf %303, %307 : vector<8x32xf32>
    %309 = vector.shape_cast %49 : vector<8x32xf32> to vector<1x8x32xf32>
    %310 = vector.shape_cast %86 : vector<8x32xf32> to vector<1x8x32xf32>
    %311 = vector.shape_cast %123 : vector<8x32xf32> to vector<1x8x32xf32>
    %312 = vector.shape_cast %160 : vector<8x32xf32> to vector<1x8x32xf32>
    %313 = vector.shape_cast %197 : vector<8x32xf32> to vector<1x8x32xf32>
    %314 = vector.shape_cast %234 : vector<8x32xf32> to vector<1x8x32xf32>
    %315 = vector.shape_cast %271 : vector<8x32xf32> to vector<1x8x32xf32>
    %316 = vector.shape_cast %308 : vector<8x32xf32> to vector<1x8x32xf32>
    %317 = tpu.concatenate %309, %310, %311, %312, %313, %314, %315, %316 in 0 : vector<1x8x32xf32>, vector<1x8x32xf32>, vector<1x8x32xf32>, vector<1x8x32xf32>, vector<1x8x32xf32>, vector<1x8x32xf32>, vector<1x8x32xf32>, vector<1x8x32xf32> -> vector<8x8x32xf32>
    %318 = vector.shape_cast %317 : vector<8x8x32xf32> to vector<64x32xf32>
    %c0_54 = arith.constant 0 : index
    %c0_55 = arith.constant 0 : index
    %319 = vector.load %arg7[%c0_54, %c0_55] : memref<32x128xf32, #tpu.memory_space<vmem>>, vector<32x128xf32>
    %cst_56 = arith.constant dense<0.000000e+00> : vector<64x128xf32>
    %320 = tpu.matmul %318, %319, %cst_56 {dimension_numbers = #tpu.dot_dimension_numbers<[1], [0], [0], [1], [0, 0, 1, 1], [], []>} : vector<64x32xf32>, vector<32x128xf32>, vector<64x128xf32> -> vector<64x128xf32>
    %c0_57 = arith.constant 0 : index
    %c0_58 = arith.constant 0 : index
    %321 = vector.load %arg8[%c0_57, %c0_58] : memref<1x1xf32, #tpu.memory_space<vmem>>, vector<1x1xf32>
    %322 = vector.broadcast %321 : vector<1x1xf32> to vector<64x128xf32>
    %323 = arith.addf %320, %322 : vector<64x128xf32>
    %324 = math.tanh %323 : vector<64x128xf32>
    %325 = vector.shape_cast %324 : vector<64x128xf32> to vector<8x8x128xf32>
    %cst_59 = arith.constant dense<0xFF800000> : vector<8x128xf32>
    %326 = vector.multi_reduction <maximumf>, %325, %cst_59 [0] : vector<8x8x128xf32> to vector<8x128xf32>
    %327 = vector.shape_cast %326 : vector<8x128xf32> to vector<1x8x128xf32>
    %328 = vector.broadcast %327 : vector<1x8x128xf32> to vector<8x8x128xf32>
    %329 = arith.subf %325, %328 : vector<8x8x128xf32>
    %330 = math.exp %329 : vector<8x8x128xf32>
    %cst_60 = arith.constant dense<0.000000e+00> : vector<8x128xf32>
    %331 = vector.multi_reduction <add>, %330, %cst_60 [0] : vector<8x8x128xf32> to vector<8x128xf32>
    %332 = vector.shape_cast %331 : vector<8x128xf32> to vector<1x8x128xf32>
    %333 = vector.broadcast %332 : vector<1x8x128xf32> to vector<8x8x128xf32>
    %334 = arith.divf %330, %333 : vector<8x8x128xf32>
    %335 = vector.extract_strided_slice %334 {offsets = [0, 0, 0], sizes = [8, 8, 32], strides = [1, 1, 1]} : vector<8x8x128xf32> to vector<8x8x32xf32>
    %336 = arith.mulf %317, %335 : vector<8x8x32xf32>
    %cst_61 = arith.constant dense<0.000000e+00> : vector<8x32xf32>
    %337 = vector.multi_reduction <add>, %336, %cst_61 [0] : vector<8x8x32xf32> to vector<8x32xf32>
    %c0_62 = arith.constant 0 : index
    %c0_63 = arith.constant 0 : index
    %338 = vector.load %arg9[%c0_62, %c0_63] : memref<32x128xf32, #tpu.memory_space<vmem>>, vector<32x128xf32>
    %cst_64 = arith.constant dense<0.000000e+00> : vector<8x128xf32>
    %339 = tpu.matmul %337, %338, %cst_64 {dimension_numbers = #tpu.dot_dimension_numbers<[1], [0], [0], [1], [0, 0, 1, 1], [], []>} : vector<8x32xf32>, vector<32x128xf32>, vector<8x128xf32> -> vector<8x128xf32>
    %c0_65 = arith.constant 0 : index
    %c0_66 = arith.constant 0 : index
    %340 = vector.load %arg10[%c0_65, %c0_66] : memref<1x128xf32, #tpu.memory_space<vmem>>, vector<1x128xf32>
    %341 = vector.broadcast %340 : vector<1x128xf32> to vector<8x128xf32>
    %342 = arith.addf %339, %341 : vector<8x128xf32>
    %c0_67 = arith.constant 0 : index
    %c0_68 = arith.constant 0 : index
    %343 = vector.load %arg11[%c0_67, %c0_68] : memref<8x128xf32, #tpu.memory_space<vmem>>, vector<8x128xf32>
    tpu.vector_store %arg11[%c0_67, %c0_68], %342 {strides = array<i32>} : memref<8x128xf32, #tpu.memory_space<vmem>>, vector<8x128xf32>,
    return
  }
}

</mosaic_0001>

<bundles_post_ra>
// kernel: lstm_predictor_with_attention.1
= control target key start
LH: loop header
LB: loop body
LE: loop exit
PB: predicated region body
PF: predicated region fallthrough
CT: control target
= control target key end

     0   :  { %vm94_vm0 = vcmask 1043456   ;;  %vm69_vm1 = vcmask 31744   ;;  %v1765_v6 = vmov 0.0   ;;  %s1766_s29 = smov 64   ;;  %s1767_s30 = smov 32   ;;  %vm139_vm6 = vcmask 261120   ;;  %s2309_s3 = inlined_call_operand.vmem [shape: f32[32,128], index: 3, kind: input, shape index: {}]   ;;  %s2310_s1 = inlined_call_operand.vmem [shape: f32[4,128], index: 1, kind: input, shape index: {}]   ;;  %s2311_s0 = inlined_call_operand.vmem [shape: f32[64,4], index: 0, kind: input, shape index: {}]   ;;  %s2312_s2 = inlined_call_operand.vmem [shape: f32[1,128], index: 2, kind: input, shape index: {}]   ;;  %s2313_s5 = inlined_call_operand.vmem [shape: f32[32,128], index: 5, kind: input, shape index: {}]   ;;  %s2314_s4 = inlined_call_operand.vmem [shape: f32[32,128], index: 4, kind: input, shape index: {}]   ;;  %s2315_s6 = inlined_call_operand.vmem [shape: f32[1,128], index: 6, kind: input, shape index: {}]   ;;  %s2316_s7 = inlined_call_operand.vmem [shape: f32[32,128], index: 7, kind: input, shape index: {}]   ;;  %s2317_s8 = inlined_call_operand.<no memory space> [shape: f32[1,1], index: 8, kind: input, shape index: {}]   ;;  %s2318_s9 = inlined_call_operand.vmem [shape: f32[32,128], index: 9, kind: input, shape index: {}]   ;;  %s2319_s10 = inlined_call_operand.vmem [shape: f32[1,128], index: 10, kind: input, shape index: {}]   ;;  %s2320_s11 = inlined_call_operand.vmem [shape: f32[8,128], index: 11, kind: output, shape index: {}]  }
   0x1   :  { %v1833_v0 = vld [vmem:[%s2309_s3 + $0x18] sm:$0xff]  ;;  %v1838_v1 = vld [vmem:[%s2309_s3 + $0x10] sm:$0xff]  ;;  %v64_v2 = vld [vmem:[%s2310_s1] sm:$0xf] }
   0x2   :  { %155 = vmatpush.msra.mxu1 %v1833_v0  ;;  %1525 = vmatpush.msk.msra.mxu0 %vm94_vm0, %v64_v2  ;;  %v56_v3 = vld [vmem:[%s2311_s0] sm:$0xff]  ;;  %v1850_v4 = vld [vmem:[%s2309_s3 + $0x8] sm:$0xff]  ;;  %v59_v32 = vld [vmem:[%s2311_s0 + $0x18] sm:$0xff] }
   0x3   :  { %1526 = vmatmul.msk.f32.vlgmr.msra.gmra.mxu0 %vm69_vm1, %v56_v3  ;;  %1581 = vmatpush.msk.msra.mxu2 %vm94_vm0, %v64_v2  ;;  %v1857_v5 = vld [vmem:[%s2309_s3] sm:$0xff]  ;;  %v1888_v33 = vld [vmem:[%s2313_s5 + $0x18] sm:$0xff]  ;;  %v1894_v34 = vld [vmem:[%s2313_s5 + $0x10] sm:$0xff] }
   0x4   :  { %156 = vmatpush.msra.mxu1 %v1838_v1  ;;  %1582 = vmatpush.msk.msra.mxu3 %vm94_vm0, %v64_v2  ;;  %v1873_v7 = vld [vmem:[%s2312_s2] ss:$0 sm:$0xff]  ;;  %v62_v35 = vld [vmem:[%s2311_s0 + $0x30] sm:$0xff]  ;;  %v1902_v36 = vld [vmem:[%s2314_s4 + $0x18] sm:$0xff] }
   0x5   :  { %1529 = vmatmul.msk.f32.vlgmr.msra.gmra.mxu2 %vm69_vm1, %v59_v32  ;;  %1532 = vmatmul.msk.f32.vlgmr.msra.gmra.mxu3 %vm69_vm1, %v62_v35  ;;  %v1909_v37 = vld [vmem:[%s2314_s4 + $0x10] sm:$0xff]  ;;  %v1915_v38 = vld [vmem:[%s2313_s5 + $0x8] sm:$0xff]  ;;  %v1930_v41 = vld [vmem:[%s2313_s5] sm:$0xff] }
   0x6   :  { %157 = vmatpush.msra.mxu1 %v1850_v4  ;;  %213 = vmatpush.msrb.mxu2 %v1888_v33  ;;  %v1921_v39 = vld [vmem:[%s2314_s4 + $0x8] sm:$0xff]  ;;  %v60_v42 = vld [vmem:[%s2311_s0 + $0x20] sm:$0xff]  ;;  %v63_v44 = vld [vmem:[%s2311_s0 + $0x38] sm:$0xff] }
   0x7   :  { %238 = vmatpush.msrb.mxu3 %v1902_v36  ;;  %v57_v40 = vld [vmem:[%s2311_s0 + $0x8] sm:$0xff]  ;;  %v1940_v43 = vld [vmem:[%s2314_s4] sm:$0xff] }
   0x8   :  { %158 = vmatpush.msra.mxu1 %v1857_v5  ;;  %214 = vmatpush.msrb.mxu2 %v1894_v34  ;;  %v61_v45 = vld [vmem:[%s2311_s0 + $0x28] sm:$0xff]  ;;  %v1991_v55 = vld [vmem:[%s2315_s6] ss:$0 sm:$0xff] }
   0x9   :  { %159 = vmatmul.f32.vlgmr.msra.gmra.mxu1 %v1765_v6  ;;  %239 = vmatpush.msrb.mxu3 %v1909_v37 }
   0xa   :  { %296 = vmatpush.msrb.mxu1 %v1833_v0  ;;  %215 = vmatpush.msrb.mxu2 %v1915_v38 }
   0xb   :  { %1527 = vmatmul.msk.f32.gmra.mxu0 %vm69_vm1, %v57_v40  ;;  %240 = vmatpush.msrb.mxu3 %v1921_v39 }
   0xc   :  { %297 = vmatpush.msrb.mxu1 %v1838_v1  ;;  %216 = vmatpush.msrb.mxu2 %v1930_v41 }
   0xd   :  { %1530 = vmatmul.msk.f32.gmra.mxu2 %vm69_vm1, %v60_v42  ;;  %241 = vmatpush.msrb.mxu3 %v1940_v43 }
   0xe   :  { %298 = vmatpush.msrb.mxu1 %v1850_v4  ;;  %1533 = vmatmul.msk.f32.gmra.mxu3 %vm69_vm1, %v63_v44 }
   0xf   :  { %359 = vmatpush.msra.mxu2 %v1888_v33  ;;  %384 = vmatpush.msra.mxu3 %v1902_v36 }
  0x10   :  { %299 = vmatpush.msrb.mxu1 %v1857_v5 }
  0x11   :  { %360 = vmatpush.msra.mxu2 %v1894_v34  ;;  %385 = vmatpush.msra.mxu3 %v1909_v37 }
  0x12   :  { %442 = vmatpush.msra.mxu1 %v1833_v0 }
  0x13   :  { %361 = vmatpush.msra.mxu2 %v1915_v38  ;;  %386 = vmatpush.msra.mxu3 %v1921_v39 }
  0x14   :  { %443 = vmatpush.msra.mxu1 %v1838_v1 }
  0x15   :  { %362 = vmatpush.msra.mxu2 %v1930_v41  ;;  %387 = vmatpush.msra.mxu3 %v1940_v43 }
  0x16   :  { %444 = vmatpush.msra.mxu1 %v1850_v4  ;;  %1531 = vmatmul.msk.f32.gmra.mxu2 %vm69_vm1, %v61_v45 }
  0x18   :  { %445 = vmatpush.msra.mxu1 %v1857_v5 }
  0x1e   :  { %217 = vmatmul.f32.vlgmr.msrb.gmra.mxu2 %v1765_v6 }
  0x1f   :  { %505 = vmatpush.msrb.mxu2 %v1888_v33 }
  0x21   :  { %506 = vmatpush.msrb.mxu2 %v1894_v34 }
  0x23   :  { %507 = vmatpush.msrb.mxu2 %v1915_v38 }
  0x25   :  { %508 = vmatpush.msrb.mxu2 %v1930_v41 }
  0x80   :  { %v115_v8 = vpop.f32.mrf.mxu0 }
  0x81   :  { %v116_v9 = vadd.f32 %v1873_v7, %v115_v8 }
  0x86   :  { %v160_v10 = vpop.f32.mrf.mxu1 }
  0x87   :  { %v163_v11 = vadd.f32 %v160_v10, %v116_v9 }
  0x88   :  { %v1978_v49 = vpop.f32.mrf.mxu2  ;;  %v1982_v51 = vpop.f32.mrf.mxu3 }
  0x89   :  { %1594 = vtanh.f32 %v163_v11  ;;  %v1534_v13 = vmul.f32 -1.442695, %v163_v11  ;;  %v118_v58 = vpop.f32.mrf.mxu0 }
  0x8a   :  { %v119_v60 = vadd.f32 %v1873_v7, %v118_v58 }
  0x8b   :  { %1596 = vpow2.f32 %v1534_v13 }
  0x8f   :  { %v1595_v12 = vpop.eup %1594 }
  0x90   :  { %186 = vrot.lane.b32.xlu0 %v1595_v12, %s1766_s29  ;;  %v1980_v50 = vpop.f32.mrf.mxu2 }
  0x91   :  { %v1597_v14 = vpop.eup %1596  ;;  %v1986_v53 = vpop.f32.mrf.mxu3 }
  0x92   :  { %v167_v15 = vadd.f32 1.0, %v1597_v14 }
  0x94   :  { %1598 = vrcp.f32 %v167_v15  ;;  %v179_v21 = vand.u32 2147483648, %v167_v15  ;;  %vm173_vm3 = vweird.f32 %v167_v15  ;;  %v177_v22 = vand.u32 2147483647, %v167_v15 }
  0x96   :  { %v180_v24 = vor.u32 1.1754944e-38, %v179_v21  ;;  %vm178_vm5 = vcmp.eq.f32.partialorder %v177_v22, 8.507059e+37 }
  0x99   :  { %v1984_v52 = vpop.f32.mrf.mxu2 }
  0x9a   :  { %v1599_v16 = vpop.eup %1598 }
  0x9b   :  { %v169_v17 = vmul.f32 %v1599_v16, %v167_v15  ;;  %vm174_vm2 = vweird.f32 %v1599_v16 }
  0x9c   :  { %vm175_vm4 = vmor %vm173_vm3, %vm174_vm2 }
  0x9d   :  { %v170_v18 = vsub.f32 1.0, %v169_v17 }
  0x9f   :  { %v171_v19 = vmul.f32 %v1599_v16, %v170_v18 }
  0xa1   :  { %v172_v20 = vadd.f32 %v1599_v16, %v171_v19  ;;  %v218_v54 = vpop.f32.mrf.mxu2 }
  0xa3   :  { %v176_v23 = vsel %vm175_vm4, %v1599_v16, %v172_v20 }
  0xa4   :  { %v181_v26 = vsel %vm178_vm5, %v180_v24, %v176_v23 }
  0xa5   :  { %v184_v28 = vmul.f32 0.0, %v181_v26 }
 0x102   :  { %v187_v25 = vpop.permute.xlu0 %186 }
 0x103   :  { %v189_v27 = vmul.f32 %v187_v25, %v181_v26 }
 0x105   :  { %191 = vrot.lane.b32.xlu0 %v189_v27, %s1767_s30 }
 0x177   :  { %v192_v29 = vpop.permute.xlu0 %191 }
 0x178   :  { %v1878_v30 = vadd.f32 %v192_v29, %v184_v28 }
 0x17a   :  { %1600 = vtanh.f32 %v1878_v30 }
 0x180   :  { %v1601_v31 = vpop.eup %1600 }
 0x181   :  { %197 = vrot.lane.b32.xlu1 %v1601_v31, %s1766_s29 }
 0x1f3   :  { %v198_v46 = vpop.permute.xlu1 %197 }
 0x1f4   :  { %v200_v47 = vmul.f32 %v198_v46, %v181_v26 }
 0x1f6   :  { %222 = vrot.lane.b32.xlu1 %v200_v47, %s1767_s30 }
 0x268   :  { %v223_v48 = vpop.permute.xlu1 %222 }
 0x269   :  { %1535 = vmatmul.msk.f32.vlgmr.msrb.gmra.mxu3 %vm139_vm6, %v223_v48  ;;  %1537 = vmatmul.msk.f32.vlgmr.msrb.gmra.mxu1 %vm139_vm6, %v223_v48 }
 0x26a   :  { %588 = vmatpush.msrb.mxu1 %v1833_v0  ;;  %530 = vmatpush.msrb.mxu3 %v1902_v36 }
 0x26c   :  { %589 = vmatpush.msrb.mxu1 %v1838_v1  ;;  %531 = vmatpush.msrb.mxu3 %v1909_v37 }
 0x26e   :  { %590 = vmatpush.msrb.mxu1 %v1850_v4  ;;  %532 = vmatpush.msrb.mxu3 %v1921_v39 }
 0x270   :  { %591 = vmatpush.msrb.mxu1 %v1857_v5  ;;  %533 = vmatpush.msrb.mxu3 %v1940_v43 }
 0x2e6   :  { %v301_v61 = vpop.f32.mrf.mxu1 }
 0x2e7   :  { %v304_v62 = vadd.f32 %v301_v61, %v119_v60  ;;  %v1309_v61 = vld [vmem:[%s2316_s7 + $0x18] sm:$0xff] }
 0x2e8   :  { %1334 = vmatpush.msrb.mxu0 %v1309_v61 }
 0x2e9   :  { %v1538_v6 = vmul.f32 -1.442695, %v304_v62 }
 0x2ec   :  { %v243_v56 = vpop.f32.mrf.mxu3 }
 0x2ed   :  { %v244_v57 = vadd.f32 %v243_v56, %v218_v54 }
 0x2ef   :  { %v246_v59 = vadd.f32 %v1991_v55, %v244_v57 }
 0x2f1   :  { %1602 = vtanh.f32 %v246_v59  ;;  %v1536_v3 = vmul.f32 -1.442695, %v246_v59 }
 0x2f2   :  { %1604 = vtanh.f32 %v304_v62  ;;  %v1308_v62 = vld [vmem:[%s2316_s7 + $0x10] sm:$0xff] }
 0x2f3   :  { %1606 = vpow2.f32 %v1536_v3  ;;  %1335 = vmatpush.msrb.mxu0 %v1308_v62 }
 0x2f4   :  { %1608 = vpow2.f32 %v1538_v6 }
 0x2f7   :  { %v1603_v63 = vpop.eup %1602 }
 0x2f8   :  { %269 = vrot.lane.b32.xlu2 %v1603_v63, %s1766_s29  ;;  %v1605_v2 = vpop.eup %1604  ;;  %v1307_v63 = vld [vmem:[%s2316_s7 + $0x8] sm:$0xff] }
 0x2f9   :  { %v1607_v8 = vpop.eup %1606  ;;  %1336 = vmatpush.msrb.mxu0 %v1307_v63 }
 0x2fa   :  { %v250_v9 = vadd.f32 1.0, %v1607_v8  ;;  %v1609_v10 = vpop.eup %1608 }
 0x2fb   :  { %v308_v11 = vadd.f32 1.0, %v1609_v10 }
 0x2fc   :  { %1610 = vrcp.f32 %v250_v9  ;;  %v262_v20 = vand.u32 2147483648, %v250_v9  ;;  %vm256_vm8 = vweird.f32 %v250_v9  ;;  %v260_v21 = vand.u32 2147483647, %v250_v9 }
 0x2fd   :  { %1612 = vrcp.f32 %v308_v11  ;;  %v320_v29 = vand.u32 2147483648, %v308_v11  ;;  %vm314_vm12 = vweird.f32 %v308_v11  ;;  %v318_v31 = vand.u32 2147483647, %v308_v11 }
 0x2fe   :  { %v263_v24 = vor.u32 1.1754944e-38, %v262_v20  ;;  %vm261_vm10 = vcmp.eq.f32.partialorder %v260_v21, 8.507059e+37 }
 0x2ff   :  { %v321_v35 = vor.u32 1.1754944e-38, %v320_v29  ;;  %vm319_vm14 = vcmp.eq.f32.partialorder %v318_v31, 8.507059e+37 }
 0x300   :  { %327 = vrot.lane.b32.xlu2 %v1605_v2, %s1766_s29  ;;  %v1306_v2 = vld [vmem:[%s2316_s7] sm:$0xff] }
 0x301   :  { %1337 = vmatpush.msrb.mxu0 %v1306_v2 }
 0x302   :  { %v1611_v12 = vpop.eup %1610 }
 0x303   :  { %v252_v13 = vmul.f32 %v1611_v12, %v250_v9  ;;  %v1613_v15 = vpop.eup %1612  ;;  %vm257_vm7 = vweird.f32 %v1611_v12 }
 0x304   :  { %v310_v17 = vmul.f32 %v1613_v15, %v308_v11  ;;  %vm258_vm9 = vmor %vm256_vm8, %vm257_vm7  ;;  %vm315_vm11 = vweird.f32 %v1613_v15 }
 0x305   :  { %v253_v14 = vsub.f32 1.0, %v252_v13  ;;  %vm316_vm13 = vmor %vm314_vm12, %vm315_vm11 }
 0x306   :  { %v311_v19 = vsub.f32 1.0, %v310_v17 }
 0x307   :  { %v254_v16 = vmul.f32 %v1611_v12, %v253_v14 }
 0x308   :  { %v312_v23 = vmul.f32 %v1613_v15, %v311_v19 }
 0x309   :  { %v255_v18 = vadd.f32 %v1611_v12, %v254_v16 }
 0x30a   :  { %v313_v28 = vadd.f32 %v1613_v15, %v312_v23 }
 0x30b   :  { %v259_v22 = vsel %vm258_vm9, %v1611_v12, %v255_v18 }
 0x30c   :  { %v264_v26 = vsel %vm261_vm10, %v263_v24, %v259_v22  ;;  %v317_v32 = vsel %vm316_vm13, %v1613_v15, %v313_v28 }
 0x30d   :  { %v322_v40 = vsel %vm319_vm14, %v321_v35, %v317_v32  ;;  %v267_v45 = vmul.f32 0.0, %v264_v26 }
 0x30e   :  { %v325_v48 = vmul.f32 %v322_v40, %v1878_v30  ;;  %v58_v30 = vld [vmem:[%s2311_s0 + $0x10] sm:$0xff] }
 0x30f   :  { %1528 = vmatmul.msk.f32.gmra.mxu0 %vm69_vm1, %v58_v30 }
 0x352   :  { %v270_v25 = vpop.permute.xlu2 %269 }
 0x353   :  { %v272_v27 = vmul.f32 %v270_v25, %v264_v26 }
 0x355   :  { %274 = vrot.lane.b32.xlu0 %v272_v27, %s1767_s30 }
 0x35a   :  { %v328_v42 = vpop.permute.xlu2 %327 }
 0x35b   :  { %v330_v44 = vmul.f32 %v328_v42, %v322_v40 }
 0x35d   :  { %332 = vrot.lane.b32.xlu1 %v330_v44, %s1767_s30 }
 0x38c   :  { %v121_v10 = vpop.f32.mrf.mxu0 }
 0x38d   :  { %v122_v11 = vadd.f32 %v1873_v7, %v121_v10 }
 0x3c7   :  { %v275_v46 = vpop.permute.xlu0 %274 }
 0x3c8   :  { %v1999_v47 = vadd.f32 %v275_v46, %v267_v45 }
 0x3ca   :  { %1614 = vtanh.f32 %v1999_v47 }
 0x3cf   :  { %v333_v54 = vpop.permute.xlu1 %332 }
 0x3d0   :  { %v1615_v56 = vpop.eup %1614  ;;  %v2003_v57 = vadd.f32 %v333_v54, %v325_v48 }
 0x3d1   :  { %280 = vrot.lane.b32.xlu2 %v1615_v56, %s1766_s29 }
 0x3d2   :  { %1616 = vtanh.f32 %v2003_v57 }
 0x3d8   :  { %v1617_v58 = vpop.eup %1616 }
 0x3d9   :  { %338 = vrot.lane.b32.xlu0 %v1617_v58, %s1766_s29 }
 0x42b   :  { %v281_v59 = vpop.permute.xlu2 %280 }
 0x42c   :  { %v2008_v60 = vmul.f32 %v281_v59, %v264_v26 }
 0x42e   :  { %343 = vrot.lane.b32.xlu1 %v2008_v60, %s1767_s30 }
 0x44b   :  { %v339_v3 = vpop.permute.xlu0 %338 }
 0x44c   :  { %v341_v6 = vmul.f32 %v339_v3, %v322_v40 }
 0x44e   :  { %368 = vrot.lane.b32.xlu2 %v341_v6, %s1767_s30 }
 0x4a0   :  { %v344_v8 = vpop.permute.xlu1 %343 }
 0x4a1   :  { %1539 = vmatmul.msk.f32.vlgmr.msra.gmra.mxu2 %vm139_vm6, %v344_v8  ;;  %1572 = vmatmul.msk.f32.vlgmr.msrb.gmra.mxu0 %vm139_vm6, %v344_v8 }
 0x4a2   :  { %651 = vmatpush.msra.mxu2 %v1888_v33 }
 0x4a4   :  { %652 = vmatpush.msra.mxu2 %v1894_v34 }
 0x4a6   :  { %653 = vmatpush.msra.mxu2 %v1915_v38 }
 0x4a8   :  { %v369_v9 = vpop.permute.xlu2 %368  ;;  %654 = vmatpush.msra.mxu2 %v1930_v41 }
 0x4a9   :  { %1540 = vmatmul.msk.f32.vlgmr.msra.gmra.mxu3 %vm139_vm6, %v369_v9  ;;  %1542 = vmatmul.msk.f32.vlgmr.msra.gmra.mxu1 %vm139_vm6, %v369_v9 }
 0x4aa   :  { %676 = vmatpush.msra.mxu3 %v1902_v36  ;;  %734 = vmatpush.msra.mxu1 %v1833_v0 }
 0x4ac   :  { %677 = vmatpush.msra.mxu3 %v1909_v37  ;;  %735 = vmatpush.msra.mxu1 %v1838_v1 }
 0x4ae   :  { %678 = vmatpush.msra.mxu3 %v1921_v39  ;;  %736 = vmatpush.msra.mxu1 %v1850_v4 }
 0x4b0   :  { %679 = vmatpush.msra.mxu3 %v1940_v43  ;;  %737 = vmatpush.msra.mxu1 %v1857_v5 }
 0x524   :  { %v364_v14 = vpop.f32.mrf.mxu2 }
 0x526   :  { %v447_v12 = vpop.f32.mrf.mxu1 }
 0x527   :  { %v450_v13 = vadd.f32 %v447_v12, %v122_v11 }
 0x529   :  { %1618 = vtanh.f32 %v450_v13  ;;  %v1543_v20 = vmul.f32 -1.442695, %v450_v13 }
 0x52c   :  { %v389_v15 = vpop.f32.mrf.mxu3 }
 0x52d   :  { %v390_v16 = vadd.f32 %v389_v15, %v364_v14 }
 0x52f   :  { %v1619_v17 = vpop.eup %1618  ;;  %v392_v18 = vadd.f32 %v1991_v55, %v390_v16 }
 0x530   :  { %473 = vrot.lane.b32.xlu1 %v1619_v17, %s1766_s29 }
 0x531   :  { %1620 = vtanh.f32 %v392_v18  ;;  %v1541_v21 = vmul.f32 -1.442695, %v392_v18 }
 0x532   :  { %1622 = vpow2.f32 %v1543_v20  ;;  %v125_v20 = vadd.f32 %v1873_v7, %v1978_v49 }
 0x533   :  { %1624 = vpow2.f32 %v1541_v21 }
 0x537   :  { %v1621_v19 = vpop.eup %1620 }
 0x538   :  { %415 = vrot.lane.b32.xlu0 %v1621_v19, %s1766_s29  ;;  %v1623_v22 = vpop.eup %1622 }
 0x539   :  { %v454_v23 = vadd.f32 1.0, %v1623_v22  ;;  %v1625_v24 = vpop.eup %1624 }
 0x53a   :  { %v396_v25 = vadd.f32 1.0, %v1625_v24 }
 0x53b   :  { %1626 = vrcp.f32 %v454_v23  ;;  %v466_v42 = vand.u32 2147483648, %v454_v23  ;;  %vm460_vm0 = vweird.f32 %v454_v23  ;;  %v464_v44 = vand.u32 2147483647, %v454_v23 }
 0x53c   :  { %1628 = vrcp.f32 %v396_v25  ;;  %v408_v30 = vand.u32 2147483648, %v396_v25  ;;  %vm402_vm4 = vweird.f32 %v396_v25  ;;  %v406_v61 = vand.u32 2147483647, %v396_v25 }
 0x53d   :  { %v467_v48 = vor.u32 1.1754944e-38, %v466_v42  ;;  %vm465_vm2 = vcmp.eq.f32.partialorder %v464_v44, 8.507059e+37 }
 0x53e   :  { %v409_v63 = vor.u32 1.1754944e-38, %v408_v30  ;;  %vm407_vm7 = vcmp.eq.f32.partialorder %v406_v61, 8.507059e+37 }
 0x541   :  { %v1627_v26 = vpop.eup %1626 }
 0x542   :  { %v456_v27 = vmul.f32 %v1627_v26, %v454_v23  ;;  %v1629_v29 = vpop.eup %1628  ;;  %vm461_vm15 = vweird.f32 %v1627_v26 }
 0x543   :  { %v398_v32 = vmul.f32 %v1629_v29, %v396_v25  ;;  %vm462_vm1 = vmor %vm460_vm0, %vm461_vm15  ;;  %vm403_vm3 = vweird.f32 %v1629_v29 }
 0x544   :  { %v457_v28 = vsub.f32 1.0, %v456_v27  ;;  %vm404_vm5 = vmor %vm402_vm4, %vm403_vm3 }
 0x545   :  { %v399_v40 = vsub.f32 1.0, %v398_v32 }
 0x546   :  { %v458_v31 = vmul.f32 %v1627_v26, %v457_v28 }
 0x547   :  { %v400_v46 = vmul.f32 %v1629_v29, %v399_v40 }
 0x548   :  { %v459_v35 = vadd.f32 %v1627_v26, %v458_v31 }
 0x549   :  { %v401_v59 = vadd.f32 %v1629_v29, %v400_v46 }
 0x54a   :  { %v463_v45 = vsel %vm462_vm1, %v1627_v26, %v459_v35 }
 0x54b   :  { %v468_v56 = vsel %vm465_vm2, %v467_v48, %v463_v45  ;;  %v405_v62 = vsel %vm404_vm5, %v1629_v29, %v401_v59 }
 0x54c   :  { %v410_v3 = vsel %vm407_vm7, %v409_v63, %v405_v62  ;;  %v471_v12 = vmul.f32 %v468_v56, %v2003_v57 }
 0x54d   :  { %v413_v8 = vmul.f32 %v410_v3, %v1999_v47 }
 0x5a2   :  { %v474_v54 = vpop.permute.xlu1 %473 }
 0x5a3   :  { %v476_v58 = vmul.f32 %v474_v54, %v468_v56 }
 0x5a5   :  { %478 = vrot.lane.b32.xlu0 %v476_v58, %s1767_s30 }
 0x5aa   :  { %v416_v2 = vpop.permute.xlu0 %415 }
 0x5ab   :  { %v418_v6 = vmul.f32 %v416_v2, %v410_v3 }
 0x5ad   :  { %420 = vrot.lane.b32.xlu2 %v418_v6, %s1767_s30 }
 0x607   :  { %v421_v9 = vpop.permute.xlu2 %420 }
 0x608   :  { %v2052_v10 = vadd.f32 %v421_v9, %v413_v8 }
 0x60a   :  { %1630 = vtanh.f32 %v2052_v10 }
 0x610   :  { %v1631_v11 = vpop.eup %1630 }
 0x611   :  { %426 = vrot.lane.b32.xlu1 %v1631_v11, %s1766_s29 }
 0x617   :  { %v479_v13 = vpop.permute.xlu0 %478 }
 0x618   :  { %v2057_v14 = vadd.f32 %v479_v13, %v471_v12 }
 0x61a   :  { %1632 = vtanh.f32 %v2057_v14 }
 0x620   :  { %v1633_v15 = vpop.eup %1632 }
 0x621   :  { %484 = vrot.lane.b32.xlu2 %v1633_v15, %s1766_s29 }
 0x67b   :  { %v485_v16 = vpop.permute.xlu2 %484 }
 0x67c   :  { %v487_v47 = vmul.f32 %v485_v16, %v468_v56 }
 0x67e   :  { %514 = vrot.lane.b32.xlu1 %v487_v47, %s1767_s30 }
 0x683   :  { %v427_v17 = vpop.permute.xlu1 %426 }
 0x684   :  { %v2062_v18 = vmul.f32 %v427_v17, %v410_v3 }
 0x686   :  { %489 = vrot.lane.b32.xlu0 %v2062_v18, %s1767_s30 }
 0x6f0   :  { %v515_v19 = vpop.permute.xlu1 %514 }
 0x6f1   :  { %1545 = vmatmul.msk.f32.vlgmr.msrb.gmra.mxu3 %vm139_vm6, %v515_v19  ;;  %1547 = vmatmul.msk.f32.vlgmr.msrb.gmra.mxu1 %vm139_vm6, %v515_v19 }
 0x6f2   :  { %822 = vmatpush.msrb.mxu3 %v1902_v36  ;;  %880 = vmatpush.msrb.mxu1 %v1833_v0 }
 0x6f4   :  { %823 = vmatpush.msrb.mxu3 %v1909_v37  ;;  %881 = vmatpush.msrb.mxu1 %v1838_v1 }
 0x6f6   :  { %824 = vmatpush.msrb.mxu3 %v1921_v39  ;;  %882 = vmatpush.msrb.mxu1 %v1850_v4 }
 0x6f8   :  { %v490_v57 = vpop.permute.xlu0 %489  ;;  %825 = vmatpush.msrb.mxu3 %v1940_v43  ;;  %883 = vmatpush.msrb.mxu1 %v1857_v5 }
 0x6f9   :  { %1544 = vmatmul.msk.f32.vlgmr.msrb.gmra.mxu2 %vm139_vm6, %v490_v57  ;;  %1573 = vmatmul.msk.f32.gmra.mxu0 %vm139_vm6, %v490_v57 }
 0x6fa   :  { %797 = vmatpush.msrb.mxu2 %v1888_v33 }
 0x6fc   :  { %798 = vmatpush.msrb.mxu2 %v1894_v34 }
 0x6fe   :  { %799 = vmatpush.msrb.mxu2 %v1915_v38 }
 0x700   :  { %800 = vmatpush.msrb.mxu2 %v1930_v41 }
 0x76e   :  { %v593_v21 = vpop.f32.mrf.mxu1 }
 0x76f   :  { %v596_v22 = vadd.f32 %v593_v21, %v125_v20 }
 0x771   :  { %1634 = vtanh.f32 %v596_v22  ;;  %v1548_v31 = vmul.f32 -1.442695, %v596_v22 }
 0x774   :  { %v535_v24 = vpop.f32.mrf.mxu3 }
 0x777   :  { %v1635_v23 = vpop.eup %1634 }
 0x778   :  { %619 = vrot.lane.b32.xlu0 %v1635_v23, %s1766_s29 }
 0x77c   :  { %v510_v25 = vpop.f32.mrf.mxu2 }
 0x77d   :  { %v536_v26 = vadd.f32 %v535_v24, %v510_v25 }
 0x77f   :  { %v538_v27 = vadd.f32 %v1991_v55, %v536_v26 }
 0x781   :  { %1636 = vtanh.f32 %v538_v27  ;;  %v1546_v29 = vmul.f32 -1.442695, %v538_v27 }
 0x783   :  { %1638 = vpow2.f32 %v1546_v29  ;;  %v128_v29 = vadd.f32 %v1873_v7, %v1980_v50 }
 0x784   :  { %1640 = vpow2.f32 %v1548_v31 }
 0x787   :  { %v1637_v28 = vpop.eup %1636 }
 0x788   :  { %561 = vrot.lane.b32.xlu2 %v1637_v28, %s1766_s29 }
 0x789   :  { %v1639_v32 = vpop.eup %1638 }
 0x78a   :  { %v542_v49 = vadd.f32 1.0, %v1639_v32  ;;  %v1641_v35 = vpop.eup %1640 }
 0x78b   :  { %v600_v40 = vadd.f32 1.0, %v1641_v35 }
 0x78c   :  { %1642 = vrcp.f32 %v542_v49  ;;  %v554_v59 = vand.u32 2147483648, %v542_v49  ;;  %vm548_vm9 = vweird.f32 %v542_v49  ;;  %v552_v30 = vand.u32 2147483647, %v542_v49 }
 0x78d   :  { %1644 = vrcp.f32 %v600_v40  ;;  %v612_v9 = vand.u32 2147483648, %v600_v40  ;;  %vm606_vm13 = vweird.f32 %v600_v40  ;;  %v610_v11 = vand.u32 2147483647, %v600_v40 }
 0x78e   :  { %v555_v63 = vor.u32 1.1754944e-38, %v554_v59  ;;  %vm553_vm11 = vcmp.eq.f32.partialorder %v552_v30, 8.507059e+37 }
 0x78f   :  { %v613_v13 = vor.u32 1.1754944e-38, %v612_v9  ;;  %vm611_vm15 = vcmp.eq.f32.partialorder %v610_v11, 8.507059e+37 }
 0x792   :  { %v1643_v42 = vpop.eup %1642 }
 0x793   :  { %v544_v44 = vmul.f32 %v1643_v42, %v542_v49  ;;  %v1645_v46 = vpop.eup %1644  ;;  %vm549_vm8 = vweird.f32 %v1643_v42 }
 0x794   :  { %v602_v54 = vmul.f32 %v1645_v46, %v600_v40  ;;  %vm550_vm10 = vmor %vm548_vm9, %vm549_vm8  ;;  %vm607_vm12 = vweird.f32 %v1645_v46 }
 0x795   :  { %v545_v45 = vsub.f32 1.0, %v544_v44  ;;  %vm608_vm14 = vmor %vm606_vm13, %vm607_vm12 }
 0x796   :  { %v603_v58 = vsub.f32 1.0, %v602_v54 }
 0x797   :  { %v546_v48 = vmul.f32 %v1643_v42, %v545_v45 }
 0x798   :  { %v604_v62 = vmul.f32 %v1645_v46, %v603_v58 }
 0x799   :  { %v547_v56 = vadd.f32 %v1643_v42, %v546_v48 }
 0x79a   :  { %v605_v8 = vadd.f32 %v1645_v46, %v604_v62 }
 0x79b   :  { %v551_v61 = vsel %vm550_vm10, %v1643_v42, %v547_v56 }
 0x79c   :  { %v556_v3 = vsel %vm553_vm11, %v555_v63, %v551_v61  ;;  %v609_v12 = vsel %vm608_vm14, %v1645_v46, %v605_v8 }
 0x79d   :  { %v614_v16 = vsel %vm611_vm15, %v613_v13, %v609_v12  ;;  %v559_v21 = vmul.f32 %v556_v3, %v2052_v10 }
 0x79e   :  { %v617_v17 = vmul.f32 %v614_v16, %v2057_v14 }
 0x7e2   :  { %v562_v2 = vpop.permute.xlu2 %561 }
 0x7e3   :  { %v564_v6 = vmul.f32 %v562_v2, %v556_v3 }
 0x7e5   :  { %566 = vrot.lane.b32.xlu1 %v564_v6, %s1767_s30 }
 0x7ea   :  { %v620_v15 = vpop.permute.xlu0 %619 }
 0x7eb   :  { %v622_v47 = vmul.f32 %v620_v15, %v614_v16 }
 0x7ed   :  { %624 = vrot.lane.b32.xlu2 %v622_v47, %s1767_s30 }
 0x847   :  { %v625_v19 = vpop.permute.xlu2 %624 }
 0x848   :  { %v2090_v57 = vadd.f32 %v625_v19, %v617_v17 }
 0x84a   :  { %1646 = vtanh.f32 %v2090_v57 }
 0x850   :  { %v1647_v20 = vpop.eup %1646 }
 0x851   :  { %630 = vrot.lane.b32.xlu1 %v1647_v20, %s1766_s29 }
 0x857   :  { %v567_v22 = vpop.permute.xlu1 %566 }
 0x858   :  { %v2095_v23 = vadd.f32 %v567_v22, %v559_v21 }
 0x85a   :  { %1648 = vtanh.f32 %v2095_v23 }
 0x860   :  { %v1649_v24 = vpop.eup %1648 }
 0x861   :  { %572 = vrot.lane.b32.xlu0 %v1649_v24, %s1766_s29 }
 0x8c3   :  { %v631_v25 = vpop.permute.xlu1 %630 }
 0x8c4   :  { %v633_v14 = vmul.f32 %v631_v25, %v614_v16 }
 0x8c6   :  { %660 = vrot.lane.b32.xlu0 %v633_v14, %s1767_s30 }
 0x8d3   :  { %v573_v26 = vpop.permute.xlu0 %572 }
 0x8d4   :  { %v2100_v27 = vmul.f32 %v573_v26, %v556_v3 }
 0x8d6   :  { %635 = vrot.lane.b32.xlu2 %v2100_v27, %s1767_s30 }
 0x930   :  { %v636_v28 = vpop.permute.xlu2 %635 }
 0x931   :  { %1549 = vmatmul.msk.f32.vlgmr.msra.gmra.mxu2 %vm139_vm6, %v636_v28  ;;  %1574 = vmatmul.msk.f32.gmra.mxu0 %vm139_vm6, %v636_v28 }
 0x932   :  { %943 = vmatpush.msra.mxu2 %v1888_v33 }
 0x934   :  { %944 = vmatpush.msra.mxu2 %v1894_v34 }
 0x936   :  { %945 = vmatpush.msra.mxu2 %v1915_v38 }
 0x938   :  { %v661_v10 = vpop.permute.xlu0 %660  ;;  %946 = vmatpush.msra.mxu2 %v1930_v41 }
 0x939   :  { %1550 = vmatmul.msk.f32.vlgmr.msra.gmra.mxu3 %vm139_vm6, %v661_v10  ;;  %1552 = vmatmul.msk.f32.vlgmr.msra.gmra.mxu1 %vm139_vm6, %v661_v10 }
 0x93a   :  { %968 = vmatpush.msra.mxu3 %v1902_v36  ;;  %1026 = vmatpush.msra.mxu1 %v1833_v0 }
 0x93c   :  { %969 = vmatpush.msra.mxu3 %v1909_v37  ;;  %1027 = vmatpush.msra.mxu1 %v1838_v1 }
 0x93e   :  { %970 = vmatpush.msra.mxu3 %v1921_v39  ;;  %1028 = vmatpush.msra.mxu1 %v1850_v4 }
 0x940   :  { %971 = vmatpush.msra.mxu3 %v1940_v43  ;;  %1029 = vmatpush.msra.mxu1 %v1857_v5 }
 0x9b4   :  { %v656_v49 = vpop.f32.mrf.mxu2 }
 0x9b6   :  { %v739_v31 = vpop.f32.mrf.mxu1 }
 0x9b7   :  { %v742_v32 = vadd.f32 %v739_v31, %v128_v29 }
 0x9b9   :  { %1650 = vtanh.f32 %v742_v32  ;;  %v1553_v46 = vmul.f32 -1.442695, %v742_v32 }
 0x9bc   :  { %v681_v35 = vpop.f32.mrf.mxu3 }
 0x9bd   :  { %v682_v40 = vadd.f32 %v681_v35, %v656_v49 }
 0x9bf   :  { %v1651_v42 = vpop.eup %1650  ;;  %v684_v44 = vadd.f32 %v1991_v55, %v682_v40 }
 0x9c0   :  { %765 = vrot.lane.b32.xlu2 %v1651_v42, %s1766_s29 }
 0x9c1   :  { %1652 = vtanh.f32 %v684_v44  ;;  %v1551_v59 = vmul.f32 -1.442695, %v684_v44 }
 0x9c2   :  { %1654 = vpow2.f32 %v1553_v46 }
 0x9c7   :  { %v1653_v45 = vpop.eup %1652 }
 0x9c8   :  { %707 = vrot.lane.b32.xlu1 %v1653_v45, %s1766_s29  ;;  %v1655_v48 = vpop.eup %1654 }
 0x9c9   :  { %v746_v54 = vadd.f32 1.0, %v1655_v48 }
 0x9cb   :  { %1656 = vrcp.f32 %v746_v54  ;;  %v758_v62 = vand.u32 2147483648, %v746_v54  ;;  %vm752_vm1 = vweird.f32 %v746_v54  ;;  %v756_v63 = vand.u32 2147483647, %v746_v54 }
 0x9cc   :  { %1658 = vpow2.f32 %v1551_v59 }
 0x9cd   :  { %v759_v6 = vor.u32 1.1754944e-38, %v758_v62  ;;  %vm757_vm3 = vcmp.eq.f32.partialorder %v756_v63, 8.507059e+37 }
 0x9d1   :  { %v1657_v50 = vpop.eup %1656 }
 0x9d2   :  { %v748_v56 = vmul.f32 %v1657_v50, %v746_v54  ;;  %vm753_vm0 = vweird.f32 %v1657_v50  ;;  %v1659_v2 = vpop.eup %1658 }
 0x9d3   :  { %vm754_vm2 = vmor %vm752_vm1, %vm753_vm0  ;;  %v688_v8 = vadd.f32 1.0, %v1659_v2 }
 0x9d4   :  { %v749_v58 = vsub.f32 1.0, %v748_v56 }
 0x9d5   :  { %1660 = vrcp.f32 %v688_v8  ;;  %v700_v19 = vand.u32 2147483648, %v688_v8  ;;  %vm694_vm5 = vweird.f32 %v688_v8  ;;  %v698_v20 = vand.u32 2147483647, %v688_v8 }
 0x9d6   :  { %v750_v30 = vmul.f32 %v1657_v50, %v749_v58 }
 0x9d7   :  { %v701_v22 = vor.u32 1.1754944e-38, %v700_v19  ;;  %vm699_vm8 = vcmp.eq.f32.partialorder %v698_v20, 8.507059e+37 }
 0x9d8   :  { %v751_v61 = vadd.f32 %v1657_v50, %v750_v30 }
 0x9da   :  { %v755_v3 = vsel %vm754_vm2, %v1657_v50, %v751_v61 }
 0x9db   :  { %v760_v11 = vsel %vm757_vm3, %v759_v6, %v755_v3  ;;  %v1661_v13 = vpop.eup %1660 }
 0x9dc   :  { %v690_v15 = vmul.f32 %v1661_v13, %v688_v8  ;;  %vm695_vm4 = vweird.f32 %v1661_v13  ;;  %v763_v26 = vmul.f32 %v760_v11, %v2090_v57 }
 0x9dd   :  { %vm696_vm7 = vmor %vm694_vm5, %vm695_vm4 }
 0x9de   :  { %v691_v16 = vsub.f32 1.0, %v690_v15 }
 0x9e0   :  { %v692_v47 = vmul.f32 %v1661_v13, %v691_v16 }
 0x9e2   :  { %v693_v17 = vadd.f32 %v1661_v13, %v692_v47 }
 0x9e4   :  { %v697_v21 = vsel %vm696_vm7, %v1661_v13, %v693_v17 }
 0x9e5   :  { %v702_v25 = vsel %vm699_vm8, %v701_v22, %v697_v21 }
 0x9e6   :  { %v705_v31 = vmul.f32 %v702_v25, %v2095_v23 }
 0xa1a   :  { %v766_v9 = vpop.permute.xlu2 %765 }
 0xa1b   :  { %v768_v12 = vmul.f32 %v766_v9, %v760_v11 }
 0xa1d   :  { %770 = vrot.lane.b32.xlu1 %v768_v12, %s1767_s30 }
 0xa3a   :  { %v708_v24 = vpop.permute.xlu1 %707 }
 0xa3b   :  { %v710_v14 = vmul.f32 %v708_v24, %v702_v25 }
 0xa3d   :  { %712 = vrot.lane.b32.xlu0 %v710_v14, %s1767_s30 }
 0xa8f   :  { %v771_v28 = vpop.permute.xlu1 %770 }
 0xa90   :  { %v2128_v10 = vadd.f32 %v771_v28, %v763_v26 }
 0xa92   :  { %1662 = vtanh.f32 %v2128_v10 }
 0xa98   :  { %v1663_v29 = vpop.eup %1662 }
 0xa99   :  { %776 = vrot.lane.b32.xlu0 %v1663_v29, %s1766_s29 }
 0xaaf   :  { %v713_v32 = vpop.permute.xlu0 %712 }
 0xab0   :  { %v2133_v49 = vadd.f32 %v713_v32, %v705_v31 }
 0xab2   :  { %1664 = vtanh.f32 %v2133_v49 }
 0xab8   :  { %v1665_v35 = vpop.eup %1664 }
 0xab9   :  { %718 = vrot.lane.b32.xlu2 %v1665_v35, %s1766_s29 }
 0xb0b   :  { %v777_v40 = vpop.permute.xlu0 %776 }
 0xb0c   :  { %v779_v57 = vmul.f32 %v777_v40, %v760_v11 }
 0xb0e   :  { %806 = vrot.lane.b32.xlu2 %v779_v57, %s1767_s30 }
 0xb13   :  { %v719_v42 = vpop.permute.xlu2 %718 }
 0xb14   :  { %v2138_v44 = vmul.f32 %v719_v42, %v702_v25  ;;  %v1757_v42 = vld [vmem:[%s2314_s4 + $0x10] sm:$0xff] }
 0xb16   :  { %781 = vrot.lane.b32.xlu1 %v2138_v44, %s1767_s30 }
 0xb68   :  { %v807_v45 = vpop.permute.xlu2 %806 }
 0xb69   :  { %1555 = vmatmul.msk.f32.vlgmr.msrb.gmra.mxu3 %vm139_vm6, %v807_v45  ;;  %1557 = vmatmul.msk.f32.vlgmr.msrb.gmra.mxu1 %vm139_vm6, %v807_v45  ;;  %v1758_v45 = vld [vmem:[%s2314_s4 + $0x8] sm:$0xff] }
 0xb6a   :  { %1114 = vmatpush.msrb.mxu3 %v1902_v36  ;;  %1172 = vmatpush.msrb.mxu1 %v1833_v0  ;;  %v131_v0 = vadd.f32 %v1873_v7, %v1984_v52 }
 0xb6c   :  { %1115 = vmatpush.msrb.mxu3 %v1909_v37  ;;  %1173 = vmatpush.msrb.mxu1 %v1838_v1 }
 0xb6e   :  { %1116 = vmatpush.msrb.mxu3 %v1921_v39  ;;  %1174 = vmatpush.msrb.mxu1 %v1850_v4 }
 0xb70   :  { %1117 = vmatpush.msrb.mxu3 %v1940_v43  ;;  %1175 = vmatpush.msrb.mxu1 %v1857_v5 }
 0xb88   :  { %v782_v23 = vpop.permute.xlu1 %781 }
 0xb89   :  { %1554 = vmatmul.msk.f32.vlgmr.msrb.gmra.mxu2 %vm139_vm6, %v782_v23  ;;  %1575 = vmatmul.msk.f32.gmra.mxu0 %vm139_vm6, %v782_v23 }
 0xb8a   :  { %1089 = vmatpush.msrb.mxu2 %v1888_v33 }
 0xb8c   :  { %1090 = vmatpush.msrb.mxu2 %v1894_v34 }
 0xb8e   :  { %1091 = vmatpush.msrb.mxu2 %v1915_v38 }
 0xb90   :  { %1092 = vmatpush.msrb.mxu2 %v1930_v41 }
 0xbe6   :  { %v885_v1 = vpop.f32.mrf.mxu1 }
 0xbe7   :  { %v888_v4 = vadd.f32 %v885_v1, %v131_v0  ;;  %v1759_v0 = vld [vmem:[%s2313_s5 + $0x18] sm:$0xff]  ;;  %v1760_v1 = vld [vmem:[%s2313_s5 + $0x10] sm:$0xff] }
 0xbe9   :  { %1666 = vtanh.f32 %v888_v4  ;;  %v1558_v38 = vmul.f32 -1.442695, %v888_v4  ;;  %v1761_v4 = vld [vmem:[%s2313_s5 + $0x8] sm:$0xff] }
 0xbec   :  { %v827_v36 = vpop.f32.mrf.mxu3 }
 0xbef   :  { %v1667_v5 = vpop.eup %1666 }
 0xbf0   :  { %911 = vrot.lane.b32.xlu1 %v1667_v5, %s1766_s29  ;;  %v2209_v5 = vld [vmem:[%s2312_s2] ss:$0 sm:$0xff] }
 0xc0c   :  { %v802_v37 = vpop.f32.mrf.mxu2 }
 0xc0d   :  { %v828_v39 = vadd.f32 %v827_v36, %v802_v37  ;;  %v134_v36 = vadd.f32 %v2209_v5, %v1982_v51 }
 0xc0f   :  { %v830_v33 = vadd.f32 %v1991_v55, %v828_v39 }
 0xc11   :  { %1668 = vtanh.f32 %v830_v33  ;;  %v1556_v58 = vmul.f32 -1.442695, %v830_v33 }
 0xc12   :  { %1670 = vpow2.f32 %v1558_v38 }
 0xc17   :  { %v1669_v34 = vpop.eup %1668 }
 0xc18   :  { %853 = vrot.lane.b32.xlu0 %v1669_v34, %s1766_s29  ;;  %v1671_v41 = vpop.eup %1670 }
 0xc19   :  { %v892_v46 = vadd.f32 1.0, %v1671_v41 }
 0xc1b   :  { %1672 = vrcp.f32 %v892_v46  ;;  %v904_v56 = vand.u32 2147483648, %v892_v46  ;;  %vm898_vm10 = vweird.f32 %v892_v46  ;;  %v902_v59 = vand.u32 2147483647, %v892_v46 }
 0xc1c   :  { %1674 = vpow2.f32 %v1556_v58 }
 0xc1d   :  { %v905_v61 = vor.u32 1.1754944e-38, %v904_v56  ;;  %vm903_vm12 = vcmp.eq.f32.partialorder %v902_v59, 8.507059e+37 }
 0xc21   :  { %v1673_v7 = vpop.eup %1672 }
 0xc22   :  { %v894_v52 = vmul.f32 %v1673_v7, %v892_v46  ;;  %vm899_vm9 = vweird.f32 %v1673_v7  ;;  %v1675_v3 = vpop.eup %1674 }
 0xc23   :  { %vm900_vm11 = vmor %vm898_vm10, %vm899_vm9  ;;  %v834_v6 = vadd.f32 1.0, %v1675_v3 }
 0xc24   :  { %v895_v48 = vsub.f32 1.0, %v894_v52 }
 0xc25   :  { %1676 = vrcp.f32 %v834_v6  ;;  %v846_v15 = vand.u32 2147483648, %v834_v6  ;;  %vm840_vm14 = vweird.f32 %v834_v6  ;;  %v844_v16 = vand.u32 2147483647, %v834_v6 }
 0xc26   :  { %v896_v54 = vmul.f32 %v1673_v7, %v895_v48 }
 0xc27   :  { %v847_v17 = vor.u32 1.1754944e-38, %v846_v15  ;;  %vm845_vm0 = vcmp.eq.f32.partialorder %v844_v16, 8.507059e+37 }
 0xc28   :  { %v897_v50 = vadd.f32 %v1673_v7, %v896_v54 }
 0xc2a   :  { %v901_v30 = vsel %vm900_vm11, %v1673_v7, %v897_v50 }
 0xc2b   :  { %v906_v63 = vsel %vm903_vm12, %v905_v61, %v901_v30  ;;  %v1677_v8 = vpop.eup %1676 }
 0xc2c   :  { %v836_v9 = vmul.f32 %v1677_v8, %v834_v6  ;;  %vm841_vm13 = vweird.f32 %v1677_v8  ;;  %v909_v22 = vmul.f32 %v906_v63, %v2128_v10 }
 0xc2d   :  { %vm842_vm15 = vmor %vm840_vm14, %vm841_vm13 }
 0xc2e   :  { %v837_v11 = vsub.f32 1.0, %v836_v9 }
 0xc30   :  { %v838_v12 = vmul.f32 %v1677_v8, %v837_v11 }
 0xc32   :  { %v839_v13 = vadd.f32 %v1677_v8, %v838_v12 }
 0xc34   :  { %v843_v47 = vsel %vm842_vm15, %v1677_v8, %v839_v13 }
 0xc35   :  { %v848_v20 = vsel %vm845_vm0, %v847_v17, %v843_v47 }
 0xc36   :  { %v851_v26 = vmul.f32 %v848_v20, %v2133_v49  ;;  %v1756_v49 = vld [vmem:[%s2314_s4 + $0x18] sm:$0xff] }
 0xc62   :  { %v912_v62 = vpop.permute.xlu1 %911 }
 0xc63   :  { %v914_v2 = vmul.f32 %v912_v62, %v906_v63 }
 0xc65   :  { %916 = vrot.lane.b32.xlu0 %v914_v2, %s1767_s30 }
 0xc8a   :  { %v854_v19 = vpop.permute.xlu0 %853 }
 0xc8b   :  { %v856_v21 = vmul.f32 %v854_v19, %v848_v20 }
 0xc8d   :  { %858 = vrot.lane.b32.xlu2 %v856_v21, %s1767_s30 }
 0xcd7   :  { %v917_v24 = vpop.permute.xlu0 %916 }
 0xcd8   :  { %v2166_v25 = vadd.f32 %v917_v24, %v909_v22 }
 0xcda   :  { %1678 = vtanh.f32 %v2166_v25 }
 0xce0   :  { %v1679_v14 = vpop.eup %1678 }
 0xce1   :  { %922 = vrot.lane.b32.xlu2 %v1679_v14, %s1766_s29 }
 0xce7   :  { %v859_v28 = vpop.permute.xlu2 %858 }
 0xce8   :  { %v2171_v29 = vadd.f32 %v859_v28, %v851_v26 }
 0xcea   :  { %1680 = vtanh.f32 %v2171_v29 }
 0xcf0   :  { %v1681_v31 = vpop.eup %1680 }
 0xcf1   :  { %864 = vrot.lane.b32.xlu1 %v1681_v31, %s1766_s29 }
 0xd3b   :  { %v923_v32 = vpop.permute.xlu2 %922 }
 0xd3c   :  { %v925_v10 = vmul.f32 %v923_v32, %v906_v63 }
 0xd3e   :  { %952 = vrot.lane.b32.xlu1 %v925_v10, %s1767_s30 }
 0xd63   :  { %v865_v35 = vpop.permute.xlu1 %864 }
 0xd64   :  { %v2176_v40 = vmul.f32 %v865_v35, %v848_v20 }
 0xd66   :  { %927 = vrot.lane.b32.xlu0 %v2176_v40, %s1767_s30 }
 0xdb0   :  { %v953_v57 = vpop.permute.xlu1 %952 }
 0xdb1   :  { %1560 = vmatmul.msk.f32.vlgmr.msra.gmra.mxu3 %vm139_vm6, %v953_v57  ;;  %1562 = vmatmul.msk.f32.vlgmr.msra.gmra.mxu1 %vm139_vm6, %v953_v57 }
 0xdb2   :  { %1260 = vmatpush.msra.mxu3 %v1756_v49 }
 0xdb4   :  { %1261 = vmatpush.msra.mxu3 %v1757_v42 }
 0xdb6   :  { %1262 = vmatpush.msra.mxu3 %v1758_v45 }
 0xdb8   :  { %1263 = vmatpush.msra.mxu3 %v1940_v43  ;;  %v1762_v43 = vld [vmem:[%s2313_s5] sm:$0xff] }
 0xdd8   :  { %v928_v23 = vpop.permute.xlu0 %927 }
 0xdd9   :  { %1559 = vmatmul.msk.f32.vlgmr.msra.gmra.mxu2 %vm139_vm6, %v928_v23  ;;  %1576 = vmatmul.msk.f32.gmra.mxu0 %vm139_vm6, %v928_v23 }
 0xdda   :  { %1235 = vmatpush.msra.mxu2 %v1759_v0  ;;  %v137_v0 = vadd.f32 %v2209_v5, %v1986_v53 }
 0xddc   :  { %1236 = vmatpush.msra.mxu2 %v1760_v1 }
 0xdde   :  { %1237 = vmatpush.msra.mxu2 %v1761_v4 }
 0xde0   :  { %1238 = vmatpush.msra.mxu2 %v1762_v43 }
 0xe2e   :  { %v1031_v37 = vpop.f32.mrf.mxu1 }
 0xe2f   :  { %v1034_v39 = vadd.f32 %v1031_v37, %v134_v36 }
 0xe31   :  { %1682 = vtanh.f32 %v1034_v39  ;;  %v1563_v52 = vmul.f32 -1.442695, %v1034_v39 }
 0xe34   :  { %v973_v34 = vpop.f32.mrf.mxu3 }
 0xe37   :  { %v1683_v33 = vpop.eup %1682 }
 0xe38   :  { %1057 = vrot.lane.b32.xlu0 %v1683_v33, %s1766_s29  ;;  %v2243_v33 = vld [vmem:[%s2315_s6] ss:$0 sm:$0xff] }
 0xe5c   :  { %v948_v38 = vpop.f32.mrf.mxu2 }
 0xe5d   :  { %v974_v41 = vadd.f32 %v973_v34, %v948_v38 }
 0xe5f   :  { %v976_v46 = vadd.f32 %v1991_v55, %v974_v41 }
 0xe61   :  { %1684 = vtanh.f32 %v976_v46  ;;  %v1561_v50 = vmul.f32 -1.442695, %v976_v46 }
 0xe62   :  { %1686 = vpow2.f32 %v1563_v52 }
 0xe67   :  { %v1685_v7 = vpop.eup %1684 }
 0xe68   :  { %999 = vrot.lane.b32.xlu2 %v1685_v7, %s1766_s29  ;;  %v1687_v48 = vpop.eup %1686 }
 0xe69   :  { %v1038_v54 = vadd.f32 1.0, %v1687_v48 }
 0xe6b   :  { %1688 = vrcp.f32 %v1038_v54  ;;  %v1050_v55 = vand.u32 2147483648, %v1038_v54  ;;  %vm1044_vm2 = vweird.f32 %v1038_v54  ;;  %v1048_v63 = vand.u32 2147483647, %v1038_v54 }
 0xe6c   :  { %1690 = vpow2.f32 %v1561_v50 }
 0xe6d   :  { %v1051_v3 = vor.u32 1.1754944e-38, %v1050_v55  ;;  %vm1049_vm4 = vcmp.eq.f32.partialorder %v1048_v63, 8.507059e+37 }
 0xe71   :  { %v1689_v51 = vpop.eup %1688 }
 0xe72   :  { %v1040_v56 = vmul.f32 %v1689_v51, %v1038_v54  ;;  %v1691_v59 = vpop.eup %1690  ;;  %vm1045_vm1 = vweird.f32 %v1689_v51 }
 0xe73   :  { %v980_v61 = vadd.f32 1.0, %v1691_v59  ;;  %vm1046_vm3 = vmor %vm1044_vm2, %vm1045_vm1 }
 0xe74   :  { %v1041_v58 = vsub.f32 1.0, %v1040_v56 }
 0xe75   :  { %1692 = vrcp.f32 %v980_v61  ;;  %v992_v47 = vand.u32 2147483648, %v980_v61  ;;  %vm986_vm7 = vweird.f32 %v980_v61  ;;  %v990_v17 = vand.u32 2147483647, %v980_v61 }
 0xe76   :  { %v1042_v30 = vmul.f32 %v1689_v51, %v1041_v58 }
 0xe77   :  { %v993_v20 = vor.u32 1.1754944e-38, %v992_v47  ;;  %vm991_vm9 = vcmp.eq.f32.partialorder %v990_v17, 8.507059e+37 }
 0xe78   :  { %v1043_v62 = vadd.f32 %v1689_v51, %v1042_v30 }
 0xe7a   :  { %v1047_v2 = vsel %vm1046_vm3, %v1689_v51, %v1043_v62 }
 0xe7b   :  { %v1052_v8 = vsel %vm1049_vm4, %v1051_v3, %v1047_v2  ;;  %v1693_v11 = vpop.eup %1692 }
 0xe7c   :  { %v982_v12 = vmul.f32 %v1693_v11, %v980_v61  ;;  %vm987_vm5 = vweird.f32 %v1693_v11  ;;  %v1055_v14 = vmul.f32 %v1052_v8, %v2166_v25 }
 0xe7d   :  { %vm988_vm8 = vmor %vm986_vm7, %vm987_vm5 }
 0xe7e   :  { %v983_v13 = vsub.f32 1.0, %v982_v12 }
 0xe80   :  { %v984_v15 = vmul.f32 %v1693_v11, %v983_v13 }
 0xe82   :  { %v985_v16 = vadd.f32 %v1693_v11, %v984_v15 }
 0xe84   :  { %v989_v19 = vsel %vm988_vm8, %v1693_v11, %v985_v16 }
 0xe85   :  { %v994_v22 = vsel %vm991_vm9, %v993_v20, %v989_v19 }
 0xe86   :  { %v997_v32 = vmul.f32 %v994_v22, %v2171_v29 }
 0xeaa   :  { %v1058_v6 = vpop.permute.xlu0 %1057 }
 0xeab   :  { %v1060_v9 = vmul.f32 %v1058_v6, %v1052_v8 }
 0xead   :  { %1062 = vrot.lane.b32.xlu2 %v1060_v9, %s1767_s30 }
 0xec2   :  { %v1000_v21 = vpop.permute.xlu2 %999 }
 0xec3   :  { %v1002_v24 = vmul.f32 %v1000_v21, %v994_v22 }
 0xec5   :  { %1004 = vrot.lane.b32.xlu1 %v1002_v24, %s1767_s30 }
 0xf07   :  { %v1063_v26 = vpop.permute.xlu2 %1062 }
 0xf08   :  { %v2219_v28 = vadd.f32 %v1063_v26, %v1055_v14 }
 0xf0a   :  { %1694 = vtanh.f32 %v2219_v28 }
 0xf10   :  { %v1695_v31 = vpop.eup %1694 }
 0xf11   :  { %1068 = vrot.lane.b32.xlu1 %v1695_v31, %s1766_s29 }
 0xf37   :  { %v1005_v10 = vpop.permute.xlu1 %1004 }
 0xf38   :  { %v2224_v35 = vadd.f32 %v1005_v10, %v997_v32 }
 0xf3a   :  { %1696 = vtanh.f32 %v2224_v35 }
 0xf40   :  { %v1697_v57 = vpop.eup %1696 }
 0xf41   :  { %1010 = vrot.lane.b32.xlu0 %v1697_v57, %s1766_s29 }
 0xf83   :  { %v1069_v49 = vpop.permute.xlu1 %1068 }
 0xf84   :  { %v1071_v25 = vmul.f32 %v1069_v49, %v1052_v8 }
 0xf86   :  { %1098 = vrot.lane.b32.xlu0 %v1071_v25, %s1767_s30 }
 0xfb3   :  { %v1011_v42 = vpop.permute.xlu0 %1010 }
 0xfb4   :  { %v2229_v45 = vmul.f32 %v1011_v42, %v994_v22 }
 0xfb6   :  { %1073 = vrot.lane.b32.xlu2 %v2229_v45, %s1767_s30 }
 0xff8   :  { %v1099_v23 = vpop.permute.xlu0 %1098 }
 0xff9   :  { %1565 = vmatmul.msk.f32.vlgmr.msrb.gmra.mxu3 %vm139_vm6, %v1099_v23  ;;  %1567 = vmatmul.msk.f32.vlgmr.msrb.gmra.mxu1 %vm139_vm6, %v1099_v23 }
0x1010   :  { %v1074_v29 = vpop.permute.xlu2 %1073 }
0x1011   :  { %1564 = vmatmul.msk.f32.vlgmr.msrb.gmra.mxu2 %vm139_vm6, %v1074_v29  ;;  %1577 = vmatmul.msk.f32.gmra.mxu0 %vm139_vm6, %v1074_v29 }
0x1076   :  { %v1177_v1 = vpop.f32.mrf.mxu1 }
0x1077   :  { %v1180_v4 = vadd.f32 %v1177_v1, %v137_v0 }
0x1079   :  { %1698 = vtanh.f32 %v1180_v4  ;;  %v1568_v53 = vmul.f32 -1.442695, %v1180_v4 }
0x107c   :  { %v1119_v36 = vpop.f32.mrf.mxu3 }
0x107f   :  { %v1699_v43 = vpop.eup %1698 }
0x1080   :  { %1203 = vrot.lane.b32.xlu2 %v1699_v43, %s1766_s29 }
0x1094   :  { %v1094_v37 = vpop.f32.mrf.mxu2 }
0x1095   :  { %v1120_v39 = vadd.f32 %v1119_v36, %v1094_v37  ;;  %v16_v36 = vstv %s2317_s8  ;;  %v1768_v37 = vmov 0   ;;  %s1769_s8 = smov 96  }
0x1096   :  { %17 = vst [vmem:[#allocation2] sm:$0x1] %v16_v36  ;;  %1588 = vset.pattern.permute.xlu1 %v1768_v37  ;;  %1589 = vset.pattern.permute.xlu0 %v1768_v37 }
0x1097   :  { %v1122_v34 = vadd.f32 %v2243_v33, %v1120_v39 }
0x1099   :  { %1700 = vtanh.f32 %v1122_v34  ;;  %v1566_v62 = vmul.f32 -1.442695, %v1122_v34 }
0x109a   :  { %1702 = vpow2.f32 %v1568_v53 }
0x109f   :  { %v1701_v38 = vpop.eup %1700 }
0x10a0   :  { %1145 = vrot.lane.b32.xlu1 %v1701_v38, %s1766_s29  ;;  %v1703_v5 = vpop.eup %1702 }
0x10a1   :  { %v1184_v41 = vadd.f32 1.0, %v1703_v5 }
0x10a3   :  { %1704 = vrcp.f32 %v1184_v41  ;;  %v1196_v51 = vand.u32 2147483648, %v1184_v41  ;;  %vm1190_vm11 = vweird.f32 %v1184_v41  ;;  %v1194_v50 = vand.u32 2147483647, %v1184_v41 }
0x10a4   :  { %1706 = vpow2.f32 %v1566_v62 }
0x10a5   :  { %v1197_v58 = vor.u32 1.1754944e-38, %v1196_v51  ;;  %vm1195_vm13 = vcmp.eq.f32.partialorder %v1194_v50, 8.507059e+37  ;;  %v1592_v51 = vld [vmem:[#allocation2] ss:$0 sm:$0xff] }
0x10a9   :  { %v1705_v46 = vpop.eup %1704 }
0x10aa   :  { %v1186_v7 = vmul.f32 %v1705_v46, %v1184_v41  ;;  %vm1191_vm10 = vweird.f32 %v1705_v46  ;;  %v1707_v55 = vpop.eup %1706 }
0x10ab   :  { %vm1192_vm12 = vmor %vm1190_vm11, %vm1191_vm10  ;;  %v1126_v63 = vadd.f32 1.0, %v1707_v55  ;;  %v1339_v55 = vpop.f32.mrf.mxu0  ;;  %vm1471_vm11 = vcmask 1048320  }
0x10ac   :  { %v1187_v52 = vsub.f32 1.0, %v1186_v7 }
0x10ad   :  { %1708 = vrcp.f32 %v1126_v63  ;;  %v1138_v11 = vand.u32 2147483648, %v1126_v63  ;;  %vm1132_vm15 = vweird.f32 %v1126_v63  ;;  %v1136_v12 = vand.u32 2147483647, %v1126_v63 }
0x10ae   :  { %v1188_v48 = vmul.f32 %v1705_v46, %v1187_v52 }
0x10af   :  { %v1139_v15 = vor.u32 1.1754944e-38, %v1138_v11  ;;  %vm1137_vm1 = vcmp.eq.f32.partialorder %v1136_v12, 8.507059e+37 }
0x10b0   :  { %v1189_v54 = vadd.f32 %v1705_v46, %v1188_v48 }
0x10b2   :  { %v1193_v56 = vsel %vm1192_vm12, %v1705_v46, %v1189_v54 }
0x10b3   :  { %v1198_v30 = vsel %vm1195_vm13, %v1197_v58, %v1193_v56  ;;  %v1709_v2 = vpop.eup %1708 }
0x10b4   :  { %v1128_v3 = vmul.f32 %v1709_v2, %v1126_v63  ;;  %vm1133_vm14 = vweird.f32 %v1709_v2  ;;  %v1201_v19 = vmul.f32 %v1198_v30, %v2219_v28  ;;  %v1342_v63 = vpop.f32.mrf.mxu0 }
0x10b5   :  { %vm1134_vm0 = vmor %vm1132_vm15, %vm1133_vm14 }
0x10b6   :  { %v1129_v6 = vsub.f32 1.0, %v1128_v3 }
0x10b8   :  { %v1130_v8 = vmul.f32 %v1709_v2, %v1129_v6 }
0x10ba   :  { %v1131_v9 = vadd.f32 %v1709_v2, %v1130_v8 }
0x10bc   :  { %v1135_v13 = vsel %vm1134_vm0, %v1709_v2, %v1131_v9  ;;  %v1345_v2 = vpop.f32.mrf.mxu0 }
0x10bd   :  { %v1140_v47 = vsel %vm1137_vm1, %v1139_v15, %v1135_v13 }
0x10be   :  { %v1143_v24 = vmul.f32 %v1140_v47, %v2224_v35 }
0x10c4   :  { %v1348_v3 = vpop.f32.mrf.mxu0 }
0x10cc   :  { %v1351_v6 = vpop.f32.mrf.mxu0 }
0x10d4   :  { %v1354_v8 = vpop.f32.mrf.mxu0 }
0x10da   :  { %v1204_v59 = vpop.permute.xlu2 %1203 }
0x10db   :  { %v1206_v61 = vmul.f32 %v1204_v59, %v1198_v30 }
0x10dd   :  { %1208 = vrot.lane.b32.xlu1 %v1206_v61, %s1767_s30 }
0x1112   :  { %v1146_v16 = vpop.permute.xlu1 %1145 }
0x1113   :  { %v1148_v17 = vmul.f32 %v1146_v16, %v1140_v47 }
0x1115   :  { %1150 = vrot.lane.b32.xlu0 %v1148_v17, %s1767_s30 }
0x114f   :  { %v1209_v20 = vpop.permute.xlu1 %1208 }
0x1150   :  { %v1211_v21 = vadd.f32 %v1209_v20, %v1201_v19 }
0x1152   :  { %1710 = vtanh.f32 %v1211_v21 }
0x1158   :  { %v1711_v22 = vpop.eup %1710 }
0x1159   :  { %1214 = vrot.lane.b32.xlu0 %v1711_v22, %s1766_s29 }
0x1187   :  { %v1151_v14 = vpop.permute.xlu0 %1150 }
0x1188   :  { %v1153_v26 = vadd.f32 %v1151_v14, %v1143_v24 }
0x118a   :  { %1712 = vtanh.f32 %v1153_v26 }
0x1190   :  { %v1713_v31 = vpop.eup %1712 }
0x1191   :  { %1156 = vrot.lane.b32.xlu2 %v1713_v31, %s1766_s29 }
0x11cb   :  { %v1215_v32 = vpop.permute.xlu0 %1214 }
0x11cc   :  { %v1217_v10 = vmul.f32 %v1215_v32, %v1198_v30 }
0x11ce   :  { %1244 = vrot.lane.b32.xlu2 %v1217_v10, %s1767_s30 }
0x11eb   :  { %v1157_v57 = vpop.permute.xlu2 %1156 }
0x11ec   :  { %v2254_v28 = vmul.f32 %v1157_v57, %v1140_v47 }
0x11ee   :  { %1219 = vrot.lane.b32.xlu1 %v2254_v28, %s1767_s30 }
0x1228   :  { %v1245_v49 = vpop.permute.xlu2 %1244 }
0x1229   :  { %1570 = vmatmul.msk.f32.vlgmr.msra.gmra.mxu3 %vm139_vm6, %v1245_v49 }
0x1260   :  { %v1220_v35 = vpop.permute.xlu1 %1219 }
0x1261   :  { %1569 = vmatmul.msk.f32.vlgmr.msra.gmra.mxu2 %vm139_vm6, %v1220_v35  ;;  %1578 = vmatmul.msk.f32.gmra.mxu0 %vm139_vm6, %v1220_v35 }
0x12ac   :  { %v1265_v25 = vpop.f32.mrf.mxu3 }
0x12de   :  { %v1357_v11 = vpop.f32.mrf.mxu0 }
0x12e4   :  { %v1240_v42 = vpop.f32.mrf.mxu2 }
0x12e5   :  { %v1266_v23 = vadd.f32 %v1265_v25, %v1240_v42 }
0x12e7   :  { %v1268_v29 = vadd.f32 %v2243_v33, %v1266_v23 }
0x12e9   :  { %1714 = vtanh.f32 %v1268_v29  ;;  %v1571_v1 = vmul.f32 -1.442695, %v1268_v29 }
0x12eb   :  { %1716 = vpow2.f32 %v1571_v1 }
0x12ef   :  { %v1715_v0 = vpop.eup %1714 }
0x12f0   :  { %1291 = vrot.lane.b32.xlu0 %v1715_v0, %s1766_s29 }
0x12f1   :  { %v1717_v4 = vpop.eup %1716 }
0x12f2   :  { %v1272_v43 = vadd.f32 1.0, %v1717_v4 }
0x12f4   :  { %1718 = vrcp.f32 %v1272_v43  ;;  %v1284_v5 = vand.u32 2147483648, %v1272_v43  ;;  %vm1278_vm3 = vweird.f32 %v1272_v43  ;;  %v1282_v41 = vand.u32 2147483647, %v1272_v43 }
0x12f6   :  { %v1285_v7 = vor.u32 1.1754944e-38, %v1284_v5  ;;  %vm1283_vm5 = vcmp.eq.f32.partialorder %v1282_v41, 8.507059e+37 }
0x12fa   :  { %v1719_v39 = vpop.eup %1718 }
0x12fb   :  { %v1274_v34 = vmul.f32 %v1719_v39, %v1272_v43  ;;  %vm1279_vm2 = vweird.f32 %v1719_v39 }
0x12fc   :  { %vm1280_vm4 = vmor %vm1278_vm3, %vm1279_vm2 }
0x12fd   :  { %v1275_v33 = vsub.f32 1.0, %v1274_v34 }
0x12ff   :  { %v1276_v38 = vmul.f32 %v1719_v39, %v1275_v33 }
0x1301   :  { %v1277_v53 = vadd.f32 %v1719_v39, %v1276_v38 }
0x1303   :  { %v1281_v46 = vsel %vm1280_vm4, %v1719_v39, %v1277_v53 }
0x1304   :  { %v1286_v48 = vsel %vm1283_vm5, %v1285_v7, %v1281_v46 }
0x1305   :  { %v1289_v50 = vmul.f32 %v1286_v48, %v1153_v26 }
0x1362   :  { %v1292_v52 = vpop.permute.xlu0 %1291 }
0x1363   :  { %v1294_v54 = vmul.f32 %v1292_v52, %v1286_v48 }
0x1365   :  { %1296 = vrot.lane.b32.xlu1 %v1294_v54, %s1767_s30 }
0x136d   :  { %1314 = vperm.xlu1 %1588, %v1592_v51  }
0x13d7   :  { %v1297_v56 = vpop.permute.xlu1 %1296 }
0x13d8   :  { %v1299_v58 = vadd.f32 %v1297_v56, %v1289_v50 }
0x13da   :  { %1720 = vtanh.f32 %v1299_v58 }
0x13df   :  { %v1315_v9 = vpop.permute.xlu1 %1314 }
0x13e0   :  { %v1721_v59 = vpop.eup %1720  ;;  %v1340_v12 = vadd.f32 %v1339_v55, %v1315_v9  ;;  %v1343_v13 = vadd.f32 %v1342_v63, %v1315_v9  ;;  %v1352_v15 = vadd.f32 %v1351_v6, %v1315_v9  ;;  %v1355_v16 = vadd.f32 %v1354_v8, %v1315_v9 }
0x13e1   :  { %1302 = vrot.lane.b32.xlu2 %v1721_v59, %s1766_s29  ;;  %v1346_v47 = vadd.f32 %v1345_v2, %v1315_v9  ;;  %v1358_v17 = vadd.f32 %v1357_v11, %v1315_v9  ;;  %v1349_v19 = vadd.f32 %v1348_v3, %v1315_v9 }
0x13e2   :  { %1722 = vtanh.f32 %v1340_v12 }
0x13e3   :  { %1724 = vtanh.f32 %v1343_v13 }
0x13e4   :  { %1726 = vtanh.f32 %v1352_v15 }
0x13e5   :  { %1728 = vtanh.f32 %v1355_v16 }
0x13e6   :  { %1730 = vtanh.f32 %v1346_v47 }
0x13e7   :  { %1732 = vtanh.f32 %v1358_v17 }
0x13e8   :  { %v1723_v22 = vpop.eup %1722  ;;  %1734 = vtanh.f32 %v1349_v19 }
0x13e9   :  { %v1725_v24 = vpop.eup %1724 }
0x13ea   :  { %v1727_v14 = vpop.eup %1726 }
0x13eb   :  { %v1729_v26 = vpop.eup %1728  ;;  %v1371_v57 = vmax.f32 %v1723_v22, %v1727_v14 }
0x13ec   :  { %v1731_v31 = vpop.eup %1730  ;;  %v1372_v49 = vmax.f32 %v1725_v24, %v1729_v26 }
0x13ed   :  { %v1733_v32 = vpop.eup %1732 }
0x13ee   :  { %v1735_v10 = vpop.eup %1734  ;;  %v1373_v25 = vmax.f32 %v1731_v31, %v1733_v32  ;;  %v1375_v23 = vmax.f32 %v1371_v57, %v1372_v49 }
0x143b   :  { %v1303_v30 = vpop.permute.xlu2 %1302 }
0x143c   :  { %v2268_v61 = vmul.f32 %v1303_v30, %v1286_v48 }
0x143e   :  { %1318 = vrot.lane.b32.xlu0 %v2268_v61, %s1767_s30 }
0x14b0   :  { %v1319_v62 = vpop.permute.xlu0 %1318 }
0x14b1   :  { %1579 = vmatmul.msk.f32.gmra.mxu0 %vm139_vm6, %v1319_v62 }
0x152e   :  { %v1360_v20 = vpop.f32.mrf.mxu0 }
0x152f   :  { %v1361_v21 = vadd.f32 %v1360_v20, %v1315_v9 }
0x1531   :  { %1736 = vtanh.f32 %v1361_v21 }
0x1537   :  { %v1737_v35 = vpop.eup %1736 }
0x1538   :  { %v1374_v42 = vmax.f32 %v1735_v10, %v1737_v35 }
0x153a   :  { %v1376_v29 = vmax.f32 %v1373_v25, %v1374_v42  ;;  %v1489_v25 = vld [vmem:[%s2318_s9 + $0x10] sm:$0xff]  ;;  %v1488_v42 = vld [vmem:[%s2318_s9 + $0x8] sm:$0xff] }
0x153c   :  { %v1377_v0 = vmax.f32 %v1375_v23, %v1376_v29  ;;  %v1487_v23 = vld [vmem:[%s2318_s9] sm:$0xff] }
0x153e   :  { %v1378_v1 = vsub.f32 %v1723_v22, %v1377_v0  ;;  %v1379_v4 = vsub.f32 %v1725_v24, %v1377_v0  ;;  %v1380_v43 = vsub.f32 %v1731_v31, %v1377_v0  ;;  %v1381_v37 = vsub.f32 %v1735_v10, %v1377_v0 }
0x153f   :  { %v1382_v34 = vsub.f32 %v1727_v14, %v1377_v0  ;;  %v1383_v53 = vsub.f32 %v1729_v26, %v1377_v0  ;;  %v1384_v5 = vsub.f32 %v1733_v32, %v1377_v0  ;;  %v1385_v46 = vsub.f32 %v1737_v35, %v1377_v0  ;;  %v1490_v35 = vld [vmem:[%s2318_s9 + $0x18] sm:$0xff] }
0x1540   :  { %v1386_v36 = vmul.f32 1.442695, %v1378_v1  ;;  %v1388_v39 = vmul.f32 1.442695, %v1379_v4  ;;  %v1390_v33 = vmul.f32 1.442695, %v1380_v43  ;;  %1512 = vmatpush.msra.mxu1 %v1490_v35 }
0x1541   :  { %v1392_v38 = vmul.f32 1.442695, %v1381_v37  ;;  %v1394_v41 = vmul.f32 1.442695, %v1382_v34  ;;  %v1396_v7 = vmul.f32 1.442695, %v1383_v53 }
0x1542   :  { %1738 = vpow2.f32 %v1386_v36  ;;  %v1398_v54 = vmul.f32 1.442695, %v1384_v5  ;;  %v1400_v56 = vmul.f32 1.442695, %v1385_v46  ;;  %1513 = vmatpush.msra.mxu1 %v1489_v25 }
0x1543   :  { %1740 = vpow2.f32 %v1388_v39 }
0x1544   :  { %1742 = vpow2.f32 %v1390_v33  ;;  %1514 = vmatpush.msra.mxu1 %v1488_v42 }
0x1545   :  { %1744 = vpow2.f32 %v1392_v38 }
0x1546   :  { %1746 = vpow2.f32 %v1394_v41  ;;  %1515 = vmatpush.msra.mxu1 %v1487_v23 }
0x1547   :  { %1748 = vpow2.f32 %v1396_v7 }
0x1548   :  { %v1739_v52 = vpop.eup %1738  ;;  %1750 = vpow2.f32 %v1398_v54 }
0x1549   :  { %v1741_v48 = vpop.eup %1740  ;;  %1752 = vpow2.f32 %v1400_v56 }
0x154a   :  { %v1402_v51 = vadd.f32 %v1741_v48, %v1739_v52  ;;  %v1743_v50 = vpop.eup %1742 }
0x154b   :  { %v1745_v59 = vpop.eup %1744 }
0x154c   :  { %v1403_v58 = vadd.f32 %v1743_v50, %v1402_v51  ;;  %v1747_v62 = vpop.eup %1746 }
0x154d   :  { %v1749_v63 = vpop.eup %1748 }
0x154e   :  { %v1404_v30 = vadd.f32 %v1745_v59, %v1403_v58  ;;  %v1751_v3 = vpop.eup %1750 }
0x154f   :  { %v1753_v8 = vpop.eup %1752 }
0x1550   :  { %v1405_v55 = vadd.f32 %v1747_v62, %v1404_v30 }
0x1552   :  { %v1406_v2 = vadd.f32 %v1749_v63, %v1405_v55 }
0x1554   :  { %v1407_v6 = vadd.f32 %v1751_v3, %v1406_v2 }
0x1556   :  { %v1408_v9 = vadd.f32 %v1753_v8, %v1407_v6 }
0x1558   :  { %1754 = vrcp.f32 %v1408_v9  ;;  %v1420_v15 = vand.u32 2147483648, %v1408_v9  ;;  %v1418_v47 = vand.u32 2147483647, %v1408_v9  ;;  %vm1414_vm8 = vweird.f32 %v1408_v9 }
0x155a   :  { %v1421_v19 = vor.u32 1.1754944e-38, %v1420_v15  ;;  %vm1419_vm10 = vcmp.eq.f32.partialorder %v1418_v47, 8.507059e+37 }
0x155e   :  { %v1755_v11 = vpop.eup %1754 }
0x155f   :  { %v1410_v12 = vmul.f32 %v1755_v11, %v1408_v9  ;;  %vm1415_vm7 = vweird.f32 %v1755_v11 }
0x1560   :  { %vm1416_vm9 = vmor %vm1414_vm8, %vm1415_vm7 }
0x1561   :  { %v1411_v13 = vsub.f32 1.0, %v1410_v12 }
0x1563   :  { %v1412_v16 = vmul.f32 %v1755_v11, %v1411_v13 }
0x1565   :  { %v1413_v17 = vadd.f32 %v1755_v11, %v1412_v16 }
0x1567   :  { %v1417_v20 = vsel %vm1416_vm9, %v1755_v11, %v1413_v17 }
0x1568   :  { %v1422_v21 = vsel %vm1419_vm10, %v1421_v19, %v1417_v20 }
0x1569   :  { %v1425_v22 = vmul.f32 %v1743_v50, %v1422_v21  ;;  %v1424_v24 = vmul.f32 %v1741_v48, %v1422_v21  ;;  %v1423_v14 = vmul.f32 %v1739_v52, %v1422_v21  ;;  %v1428_v26 = vmul.f32 %v1749_v63, %v1422_v21 }
0x156a   :  { %v1427_v31 = vmul.f32 %v1747_v62, %v1422_v21  ;;  %v1426_v32 = vmul.f32 %v1745_v59, %v1422_v21  ;;  %v1430_v10 = vmul.f32 %v1753_v8, %v1422_v21  ;;  %v1429_v57 = vmul.f32 %v1751_v3, %v1422_v21 }
0x156b   :  { %1443 = vrot.lane.b32.xlu1 %v1425_v22, %s1769_s8  ;;  %1441 = vrot.lane.b32.xlu0 %v1424_v24, %s1769_s8 }
0x156c   :  { %1439 = vrot.lane.b32.xlu2 %v1423_v14, %s1769_s8 }
0x1573   :  { %1449 = vrot.lane.b32.xlu1 %v1428_v26, %s1769_s8  ;;  %1447 = vrot.lane.b32.xlu0 %v1427_v31, %s1769_s8 }
0x1574   :  { %1445 = vrot.lane.b32.xlu2 %v1426_v32, %s1769_s8 }
0x157b   :  { %1453 = vrot.lane.b32.xlu0 %v1430_v10, %s1769_s8 }
0x157c   :  { %1451 = vrot.lane.b32.xlu2 %v1429_v57, %s1769_s8 }
0x15c6   :  { %v1440_v49 = vpop.permute.xlu2 %1439 }
0x15c7   :  { %v1463_v29 = vmul.f32 %v1440_v49, %v2008_v60 }
0x15c9   :  { %v1472_v37 = vsel %vm1471_vm11, %v1463_v29, 0.0 }
0x15ce   :  { %v1446_v0 = vpop.permute.xlu2 %1445 }
0x15cf   :  { %v1466_v33 = vmul.f32 %v1446_v0, %v2138_v44 }
0x15d1   :  { %v1477_v41 = vsel %vm1471_vm11, %v1466_v33, 0.0 }
0x15d6   :  { %v1452_v7 = vpop.permute.xlu2 %1451 }
0x15d7   :  { %v1469_v54 = vmul.f32 %v1452_v7, %v2254_v28  ;;  %v1593_v28 = vld [vmem:[%s2319_s10] ss:$0 sm:$0xff] }
0x15d9   :  { %v1483_v56 = vsel %vm1471_vm11, %v1469_v54, 0.0 }
0x15dd   :  { %v1444_v1 = vpop.permute.xlu1 %1443  ;;  %v1442_v4 = vpop.permute.xlu0 %1441 }
0x15de   :  { %v1465_v43 = vmul.f32 %v1444_v1, %v2100_v27  ;;  %v1464_v36 = vmul.f32 %v1442_v4, %v2062_v18 }
0x15e0   :  { %v1473_v39 = vsel %vm1471_vm11, %v1464_v36, 0.0  ;;  %v1475_v38 = vsel %vm1471_vm11, %v1465_v43, 0.0 }
0x15e1   :  { %v1474_v34 = vadd.f32 %v1473_v39, %v1472_v37 }
0x15e3   :  { %v1476_v53 = vadd.f32 %v1475_v38, %v1474_v34 }
0x15e5   :  { %v1450_v5 = vpop.permute.xlu1 %1449  ;;  %v1448_v60 = vpop.permute.xlu0 %1447  ;;  %v1478_v18 = vadd.f32 %v1477_v41, %v1476_v53 }
0x15e6   :  { %v1468_v46 = vmul.f32 %v1450_v5, %v2229_v45  ;;  %v1467_v27 = vmul.f32 %v1448_v60, %v2176_v40 }
0x15e8   :  { %v1479_v52 = vsel %vm1471_vm11, %v1467_v27, 0.0  ;;  %v1481_v44 = vsel %vm1471_vm11, %v1468_v46, 0.0 }
0x15e9   :  { %v1480_v48 = vadd.f32 %v1479_v52, %v1478_v18 }
0x15eb   :  { %v1482_v51 = vadd.f32 %v1481_v44, %v1480_v48 }
0x15ed   :  { %v1454_v50 = vpop.permute.xlu0 %1453  ;;  %v1484_v59 = vadd.f32 %v1483_v56, %v1482_v51 }
0x15ee   :  { %v1470_v58 = vmul.f32 %v1454_v50, %v2268_v61 }
0x15f0   :  { %v1485_v45 = vsel %vm1471_vm11, %v1470_v58, 0.0 }
0x15f1   :  { %v1486_v30 = vadd.f32 %v1485_v45, %v1484_v59 }
0x15f3   :  { %1496 = vrot.lane.b32.xlu1 %v1486_v30, %s1767_s30 }
0x1665   :  { %v1497_v40 = vpop.permute.xlu1 %1496 }
0x1666   :  { %1580 = vmatmul.msk.f32.vlgmr.msra.gmra.mxu1 %vm139_vm6, %v1497_v40 }
0x16e3   :  { %v1517_v62 = vpop.f32.mrf.mxu1 }
0x16e4   :  { %v1518_v55 = vadd.f32 %v1593_v28, %v1517_v62 }
0x16e6   :  { %1520 = vst [vmem:[%s2320_s11] sm:$0xff] %v1518_v55 }

</bundles_post_ra>
